<compile_context>
chip_gen: v7x
topology: tpu7x:2x2x1
jax: 0.10.0
libtpu: 0.0.40
codegen_flags: <defaults>
</compile_context>

<pallas_src>
import jax
import jax.numpy as jnp
from jax.experimental import pallas as pl
from jax.experimental.pallas import tpu as pltpu

LANE = 128
SUBLANE = 8


def _round_up(x, m):
    return (x + m - 1) // m * m


def _pad2(a, rows, cols):
    return jnp.pad(a, ((0, rows - a.shape[0]), (0, cols - a.shape[1])))


def _vmem_cap_bytes():
    try:
        return int(pltpu.get_tpu_info().vmem_capacity_bytes)   # 128 MiB v5e/v6e, 64 MiB v7x
    except Exception:
        return 64 << 20


def _vmem_limit(n_bytes, headroom=8 << 20):
    cap = int(0.75 * _vmem_cap_bytes())                        # ~96 MiB v5e/v6e, ~48 MiB v7x
    return int(min(max(int(n_bytes) + headroom, 16 << 20), cap))


# ----------------------------------------------------------------------------- fused kernel (small graphs)

def _fused_gcn_kernel(bag_ref, invb_ref, wemb_ref, adj_ref, invd_ref,
                      w1l_ref, w1r_ref, b1_ref, w2l_ref, w2r_ref, b2_ref,
                      pool_ref, invp_ref, wo_ref, bo_ref, out_ref):
    bf16, f32 = jnp.bfloat16, jnp.float32
    # EmbeddingBag(mean, padding_idx): integer token-count matrix @ table, exact f32 1/count scale.
    x0 = jnp.dot(bag_ref[...], wemb_ref[...], preferred_element_type=f32)
    x0 = (x0 * invb_ref[...]).astype(bf16)
    adj = adj_ref[...].astype(bf16)            # int8 edge multiplicities -> bf16 (small ints, exact)

    def sage(x, wl_ref, wr_ref, b_ref):
        # mean aggregation over incoming edges = (edge-count adjacency @ x) * 1/deg   (f32 scale)
        agg = jnp.dot(adj, x, preferred_element_type=f32) * invd_ref[...]
        h = (jnp.dot(agg.astype(bf16), wl_ref[...], preferred_element_type=f32)
             + jnp.dot(x, wr_ref[...], preferred_element_type=f32)
             + b_ref[...])
        return jnp.maximum(h, 0.0).astype(bf16)

    h1 = sage(x0, w1l_ref, w1r_ref, b1_ref)
    h2 = sage(h1, w2l_ref, w2r_ref, b2_ref)
    # global_mean_pool + output Linear
    g = jnp.dot(pool_ref[...], h2, preferred_element_type=f32) * invp_ref[...]
    out_ref[...] = (jnp.dot(g.astype(bf16), wo_ref[...], preferred_element_type=f32)
                    + bo_ref[...])


# ----------------------------------------------------------------------------- tiled kernels (large graphs)

def _embed_kernel(bag_ref, invb_ref, wemb_ref, x_ref):
    x = jnp.dot(bag_ref[...], wemb_ref[...], preferred_element_type=jnp.float32)
    x_ref[...] = (x * invb_ref[...]).astype(x_ref.dtype)


def _sage_relu_kernel(adj_ref, xk_ref, invd_ref, xblk_ref,
                      wl_ref, wr_ref, b_ref, out_ref, acc_ref):
    k = pl.program_id(1)

    @pl.when(k == 0)
    def _():
        acc_ref[...] = jnp.zeros_like(acc_ref)

    # partial mean-aggregation sum over this block of the node-contraction axis
    acc_ref[...] += jnp.dot(adj_ref[...].astype(jnp.bfloat16), xk_ref[...],
                            preferred_element_type=jnp.float32)

    @pl.when(k == pl.num_programs(1) - 1)
    def _():
        agg = (acc_ref[...] * invd_ref[...]).astype(jnp.bfloat16)
        h = (jnp.dot(agg, wl_ref[...], preferred_element_type=jnp.float32)
             + jnp.dot(xblk_ref[...], wr_ref[...], preferred_element_type=jnp.float32)
             + b_ref[...])
        out_ref[...] = jnp.maximum(h, 0.0).astype(out_ref.dtype)


def _pool_out_kernel(pool_ref, h_ref, invp_ref, wo_ref, bo_ref, out_ref, acc_ref):
    k = pl.program_id(0)

    @pl.when(k == 0)
    def _():
        acc_ref[...] = jnp.zeros_like(acc_ref)

    acc_ref[...] += jnp.dot(pool_ref[...], h_ref[...], preferred_element_type=jnp.float32)

    @pl.when(k == pl.num_programs(0) - 1)
    def _():
        g = (acc_ref[...] * invp_ref[...]).astype(jnp.bfloat16)
        out_ref[...] = (jnp.dot(g, wo_ref[...], preferred_element_type=jnp.float32)
                        + bo_ref[...])


# ----------------------------------------------------------------------------- wrapper

def gcn_forward(bag_counts, inv_bag, w_emb, adj_counts, inv_deg,
                w1l, w1r, b1, w2l, w2r, b2,
                pool01, inv_pool, w_out, b_out,
                *, force_tiled=False, tm=None, tk=None):
    n, v = bag_counts.shape
    d = w_emb.shape[1]
    hd = w1l.shape[1]
    g = pool01.shape[0]
    c = w_out.shape[1]

    v_p = _round_up(v, LANE)
    d_p = _round_up(d, LANE)
    h_p = _round_up(hd, LANE)
    c_p = _round_up(c, LANE)
    g_p = _round_up(g, SUBLANE)

    bf16 = jnp.bfloat16
    f32 = jnp.float32

    # Shared padded weights (zero padding keeps math exact: pad rows/cols contribute zero).
    wemb_p = _pad2(w_emb, v_p, d_p).astype(bf16)
    w1l_p = _pad2(w1l, d_p, h_p).astype(bf16)
    w1r_p = _pad2(w1r, d_p, h_p).astype(bf16)
    w2l_p = _pad2(w2l, h_p, h_p).astype(bf16)
    w2r_p = _pad2(w2r, h_p, h_p).astype(bf16)
    wo_p = _pad2(w_out, h_p, c_p).astype(bf16)
    b1_p = _pad2(b1, 1, h_p).astype(f32)
    b2_p = _pad2(b2, 1, h_p).astype(f32)
    bo_p = _pad2(b_out, 1, c_p).astype(f32)

    def node_padded(n_p):
        bag_p = _pad2(bag_counts, n_p, v_p).astype(bf16)             # integer counts (exact in bf16)
        invb_p = _pad2(inv_bag.reshape(-1, 1), n_p, 1).astype(f32)
        adj_p = _pad2(adj_counts, n_p, n_p).astype(jnp.int8)         # edge multiplicities
        invd_p = _pad2(inv_deg.reshape(-1, 1), n_p, 1).astype(f32)
        pool_p = _pad2(pool01, g_p, n_p).astype(bf16)                # binary graph membership
        invp_p = _pad2(inv_pool.reshape(-1, 1), g_p, 1).astype(f32)
        return bag_p, invb_p, adj_p, invd_p, pool_p, invp_p

    # ---- fused single-call path (everything resident in VMEM) ----------------
    n_small = _round_up(n, LANE)
    fused_bytes = (n_small * v_p * 2 + v_p * d_p * 2 + n_small * n_small      # operands
                   + g_p * n_small * 2 + 2 * (d_p + h_p) * h_p * 2 + h_p * c_p * 2
                   + 4 * n_small * max(d_p, h_p) * 4 + g_p * h_p * 4)         # f32 intermediates
    use_fused = (not force_tiled) and fused_bytes < (16 << 20)

    if use_fused:
        n_p = n_small
        bag_p, invb_p, adj_p, invd_p, pool_p, invp_p = node_padded(n_p)
        vmem = pl.BlockSpec(memory_space=pltpu.MemorySpace.VMEM)
        flops = 2 * (n_p * v_p * d_p + 2 * n_p * n_p * max(d_p, h_p)
                     + 2 * n_p * d_p * h_p + 2 * n_p * h_p * h_p
                     + g_p * n_p * h_p + g_p * h_p * c_p)
        out_p = pl.pallas_call(
            _fused_gcn_kernel,
            out_shape=jax.ShapeDtypeStruct((g_p, c_p), f32),
            in_specs=[vmem] * 15,
            out_specs=vmem,
            compiler_params=pltpu.CompilerParams(
                vmem_limit_bytes=_vmem_limit(fused_bytes, headroom=4 << 20)),
            cost_estimate=pl.CostEstimate(flops=flops, transcendentals=0,
                                          bytes_accessed=int(fused_bytes)),
        )(bag_p, invb_p, wemb_p, adj_p, invd_p,
          w1l_p, w1r_p, b1_p, w2l_p, w2r_p, b2_p,
          pool_p, invp_p, wo_p, bo_p)
        return out_p[:g, :c]

    # ---- tiled multi-kernel path ---------------------------------------------
    # Row tile: >= 2 blocks so v7x's two TensorCores both work; bigger tiles for big N
    # (v5e/v6e have 128 MiB VMEM). K tile caps VMEM independent of N.
    n_128 = _round_up(n, LANE)
    if tk is None:
        tk = min(2048, n_128)
    if tm is None:
        if n_128 <= 128:
            tm = 64
        elif n_128 < 2048:
            tm = 128
        elif n_128 < 4096:
            tm = 256
        else:
            tm = 512
    n_p = _round_up(n, max(tm, tk))
    assert n_p % tm == 0 and n_p % tk == 0
    n_blk, k_blk = n_p // tm, n_p // tk

    bag_p, invb_p, adj_p, invd_p, pool_p, invp_p = node_padded(n_p)

    # EmbeddingBag (mean) -------------------------------------------------------
    # TODO(synk): for realistic vocabularies (30k+) replace the dense [N, V] lowering with a
    # scalar-prefetch DMA gather of embedding rows (PrefetchScalarGridSpec + SMEM token ids).
    embed_blk = tm * v_p * 2 + tm * 4 + v_p * d_p * 2 + tm * d_p * 2
    x0 = pl.pallas_call(
        _embed_kernel,
        out_shape=jax.ShapeDtypeStruct((n_p, d_p), bf16),
        grid=(n_blk,),
        in_specs=[pl.BlockSpec((tm, v_p), lambda i: (i, 0)),       # bag counts (streamed)
                  pl.BlockSpec((tm, 1), lambda i: (i, 0)),         # f32 1/bag-count
                  pl.BlockSpec((v_p, d_p), lambda i: (0, 0))],     # embedding table (resident)
        out_specs=pl.BlockSpec((tm, d_p), lambda i: (i, 0)),
        compiler_params=pltpu.CompilerParams(
            dimension_semantics=("parallel",),
            vmem_limit_bytes=_vmem_limit(2 * embed_blk)),
        cost_estimate=pl.CostEstimate(
            flops=2 * n_p * v_p * d_p, transcendentals=0,
            bytes_accessed=n_p * v_p * 2 + v_p * d_p * 2 + n_p * d_p * 2),
    )(bag_p, invb_p, wemb_p)

    # SAGEConv + ReLU (x2) ------------------------------------------------------
    # TODO(synk): grid-invariant operands (x K-blocks excluded) could be single-buffered with
    # pipeline_mode=pl.Buffered(1) to shave VMEM; skipped here to keep lowering conservative.
    def sage_layer(x, wl, wr, bias, d_in, d_out):
        blk = (tm * tk + tk * d_in * 2 + tm * 4 + tm * d_in * 2
               + 2 * d_in * d_out * 2 + d_out * 4 + tm * d_out * 2)
        return pl.pallas_call(
            _sage_relu_kernel,
            out_shape=jax.ShapeDtypeStruct((n_p, d_out), bf16),
            grid=(n_blk, k_blk),
            in_specs=[pl.BlockSpec((tm, tk), lambda i, k: (i, k)),       # int8 edge counts (streamed)
                      pl.BlockSpec((tk, d_in), lambda i, k: (k, 0)),     # x contraction block
                      pl.BlockSpec((tm, 1), lambda i, k: (i, 0)),        # f32 1/deg
                      pl.BlockSpec((tm, d_in), lambda i, k: (i, 0)),     # x row block (self term)
                      pl.BlockSpec((d_in, d_out), lambda i, k: (0, 0)),  # w_l (resident)
                      pl.BlockSpec((d_in, d_out), lambda i, k: (0, 0)),  # w_r (resident)
                      pl.BlockSpec((1, d_out), lambda i, k: (0, 0))],    # bias
            out_specs=pl.BlockSpec((tm, d_out), lambda i, k: (i, 0)),
            scratch_shapes=[pltpu.VMEM((tm, d_in), jnp.float32)],        # agg accumulator
            compiler_params=pltpu.CompilerParams(
                dimension_semantics=("parallel", "arbitrary"),
                vmem_limit_bytes=_vmem_limit(2 * blk + tm * d_in * 4)),
            cost_estimate=pl.CostEstimate(
                flops=2 * n_p * n_p * d_in + 4 * n_p * d_in * d_out,
                transcendentals=0,
                bytes_accessed=(n_p * n_p + n_blk * n_p * d_in * 2 + n_p * d_in * 2
                                + 2 * d_in * d_out * 2 + n_p * d_out * 2)),
        )(adj_p, x, invd_p, x, wl, wr, bias)

    h1 = sage_layer(x0, w1l_p, w1r_p, b1_p, d_p, h_p)
    h2 = sage_layer(h1, w2l_p, w2r_p, b2_p, h_p, h_p)

    # global_mean_pool + output Linear (reduction grid over nodes) ---------------
    pool_blk = g_p * tk * 2 + tk * h_p * 2 + g_p * 4 + h_p * c_p * 2 + c_p * 4 + g_p * c_p * 4
    out_p = pl.pallas_call(
        _pool_out_kernel,
        out_shape=jax.ShapeDtypeStruct((g_p, c_p), f32),
        grid=(k_blk,),
        in_specs=[pl.BlockSpec((g_p, tk), lambda k: (0, k)),       # binary pooling block (streamed)
                  pl.BlockSpec((tk, h_p), lambda k: (k, 0)),       # h2 contraction block
                  pl.BlockSpec((g_p, 1), lambda k: (0, 0)),        # f32 1/|graph|
                  pl.BlockSpec((h_p, c_p), lambda k: (0, 0)),
                  pl.BlockSpec((1, c_p), lambda k: (0, 0))],
        out_specs=pl.BlockSpec((g_p, c_p), lambda k: (0, 0)),
        scratch_shapes=[pltpu.VMEM((g_p, h_p), jnp.float32)],
        compiler_params=pltpu.CompilerParams(
            dimension_semantics=("arbitrary",),
            vmem_limit_bytes=_vmem_limit(2 * pool_blk + g_p * h_p * 4)),
        cost_estimate=pl.CostEstimate(
            flops=2 * g_p * n_p * h_p + 2 * g_p * h_p * c_p, transcendentals=0,
            bytes_accessed=g_p * n_p * 2 + n_p * h_p * 2 + h_p * c_p * 2 + g_p * c_p * 4),
    )(pool_p, h2, invp_p, wo_p, bo_p)

    return out_p[:g, :c]


# ----------------------------------------------------------------------------- JAX glue

def build_bag_counts(tokens, vocab_size, pad_idx):
    # EmbeddingBag(mode='mean', padding_idx): mean of non-pad token embeddings per bag (0 if empty).
    valid = tokens != pad_idx
    onehot = (tokens[:, :, None] == jnp.arange(vocab_size)[None, None, :]) & valid[:, :, None]
    counts = onehot.sum(axis=1).astype(jnp.float32)                    # [N, V] integer token counts
    denom = jnp.maximum(valid.sum(axis=1), 1).astype(jnp.float32)      # [N]
    return counts, 1.0 / denom


def build_adjacency_counts(edge_index, num_nodes):
    # SAGEConv mean aggregation over incoming edges (duplicate edges counted, as in scatter-mean).
    src, tgt = edge_index[0], edge_index[1]
    counts = jnp.zeros((num_nodes, num_nodes), jnp.float32).at[tgt, src].add(1.0)
    deg = jnp.maximum(counts.sum(axis=1), 1.0)
    return counts, 1.0 / deg


def build_pool(batch, num_graphs):
    # global_mean_pool: binary membership matrix + f32 1/|graph|.
    onehot = (batch[None, :] == jnp.arange(num_graphs)[:, None]).astype(jnp.float32)
    cnt = jnp.maximum(onehot.sum(axis=1), 1.0)
    return onehot, 1.0 / cnt


if __name__ == "__main__":
    vocab_size = 32
    embed_dim = 16
    hidden_dim = 32
    num_classes = 8
    pad_idx = 0
    num_nodes = 16
    bag_size = 8
    num_edges = 40
    num_graphs = 2

    key = jax.random.PRNGKey(0)
    keys = jax.random.split(key, 12)

    # Deterministic synthetic parameters (weights stored pre-transposed: [in, out]).
    w_emb = 0.1 * jax.random.normal(keys[0], (vocab_size, embed_dim), jnp.float32)
    w_emb = w_emb.at[pad_idx].set(0.0)
    w1l = 0.1 * jax.random.normal(keys[1], (embed_dim, hidden_dim), jnp.float32)
    w1r = 0.1 * jax.random.normal(keys[2], (embed_dim, hidden_dim), jnp.float32)
    b1 = 0.1 * jax.random.normal(keys[3], (1, hidden_dim), jnp.float32)
    w2l = 0.1 * jax.random.normal(keys[4], (hidden_dim, hidden_dim), jnp.float32)
    w2r = 0.1 * jax.random.normal(keys[5], (hidden_dim, hidden_dim), jnp.float32)
    b2 = 0.1 * jax.random.normal(keys[6], (1, hidden_dim), jnp.float32)
    w_out = 0.1 * jax.random.normal(keys[7], (hidden_dim, num_classes), jnp.float32)
    b_out = 0.1 * jax.random.normal(keys[8], (1, num_classes), jnp.float32)

    # Deterministic synthetic graph data.
    tokens = jax.random.randint(keys[9], (num_nodes, bag_size), 0, vocab_size, jnp.int32)
    edge_index = jax.random.randint(keys[10], (2, num_edges), 0, num_nodes, jnp.int32)
    batch = jnp.sort(jax.random.randint(keys[11], (num_nodes,), 0, num_graphs, jnp.int32))

    bag_counts, inv_bag = build_bag_counts(tokens, vocab_size, pad_idx)
    adj_counts, inv_deg = build_adjacency_counts(edge_index, num_nodes)
    pool01, inv_pool = build_pool(batch, num_graphs)

    args = (bag_counts, inv_bag, w_emb, adj_counts, inv_deg,
            w1l, w1r, b1, w2l, w2r, b2, pool01, inv_pool, w_out, b_out)

    out_fused = jax.block_until_ready(gcn_forward(*args))                    # single fused call
    out_tiled = jax.block_until_ready(gcn_forward(*args, force_tiled=True))  # tiled multi-kernel path

    # Pure-JAX f32 reference (module semantics); kernel uses bf16 MXU operands -> loose tolerance.
    bag_mat = bag_counts * inv_bag[:, None]
    adj = adj_counts * inv_deg[:, None]
    pool_mat = pool01 * inv_pool[:, None]
    x0 = bag_mat @ w_emb
    h1 = jnp.maximum(adj @ x0 @ w1l + x0 @ w1r + b1, 0.0)
    h2 = jnp.maximum(adj @ h1 @ w2l + h1 @ w2r + b2, 0.0)
    ref = pool_mat @ h2 @ w_out + b_out

    assert out_fused.shape == (num_graphs, num_classes)
    assert out_tiled.shape == (num_graphs, num_classes)
    assert jnp.allclose(out_fused, ref, atol=3e-2, rtol=3e-2), jnp.max(jnp.abs(out_fused - ref))
    assert jnp.allclose(out_tiled, ref, atol=3e-2, rtol=3e-2), jnp.max(jnp.abs(out_tiled - ref))

    print("KERNEL_OK")
</pallas_src>

<mosaic_0001>
module attributes {stable_mosaic.version = 11 : i64} {
  func.func @_fused_gcn_kernel(%arg0: memref<128x128xbf16, #tpu.memory_space<vmem>>, %arg1: memref<128x1xf32, #tpu.memory_space<vmem>>, %arg2: memref<128x128xbf16, #tpu.memory_space<vmem>>, %arg3: memref<128x128xi8, #tpu.memory_space<vmem>>, %arg4: memref<128x1xf32, #tpu.memory_space<vmem>>, %arg5: memref<128x128xbf16, #tpu.memory_space<vmem>>, %arg6: memref<128x128xbf16, #tpu.memory_space<vmem>>, %arg7: memref<1x128xf32, #tpu.memory_space<vmem>>, %arg8: memref<128x128xbf16, #tpu.memory_space<vmem>>, %arg9: memref<128x128xbf16, #tpu.memory_space<vmem>>, %arg10: memref<1x128xf32, #tpu.memory_space<vmem>>, %arg11: memref<8x128xbf16, #tpu.memory_space<vmem>>, %arg12: memref<8x1xf32, #tpu.memory_space<vmem>>, %arg13: memref<128x128xbf16, #tpu.memory_space<vmem>>, %arg14: memref<1x128xf32, #tpu.memory_space<vmem>>, %arg15: memref<8x128xf32, #tpu.memory_space<vmem>>) attributes {dimension_semantics = [], scalar_prefetch = 0 : i64, scratch_operands = 0 : i64, tpu.core_type = #tpu.core_type<tc>} {
    %c0 = arith.constant 0 : index
    %c0_0 = arith.constant 0 : index
    %0 = vector.load %arg0[%c0, %c0_0] : memref<128x128xbf16, #tpu.memory_space<vmem>>, vector<128x128xbf16>
    %c0_1 = arith.constant 0 : index
    %c0_2 = arith.constant 0 : index
    %1 = vector.load %arg2[%c0_1, %c0_2] : memref<128x128xbf16, #tpu.memory_space<vmem>>, vector<128x128xbf16>
    %cst = arith.constant dense<0.000000e+00> : vector<128x128xf32>
    %2 = tpu.matmul %0, %1, %cst {dimension_numbers = #tpu.dot_dimension_numbers<[1], [0], [0], [1], [0, 0, 1, 1], [], []>} : vector<128x128xbf16>, vector<128x128xbf16>, vector<128x128xf32> -> vector<128x128xf32>
    %c0_3 = arith.constant 0 : index
    %c0_4 = arith.constant 0 : index
    %3 = vector.load %arg1[%c0_3, %c0_4] : memref<128x1xf32, #tpu.memory_space<vmem>>, vector<128x1xf32>
    %4 = vector.broadcast %3 : vector<128x1xf32> to vector<128x128xf32>
    %5 = arith.mulf %2, %4 : vector<128x128xf32>
    %6 = arith.truncf %5 : vector<128x128xf32> to vector<128x128xbf16>
    %c0_5 = arith.constant 0 : index
    %c0_6 = arith.constant 0 : index
    %7 = vector.load %arg3[%c0_5, %c0_6] : memref<128x128xi8, #tpu.memory_space<vmem>>, vector<128x128xi8>
    %8 = arith.sitofp %7 : vector<128x128xi8> to vector<128x128xbf16>
    %cst_7 = arith.constant dense<0.000000e+00> : vector<128x128xf32>
    %9 = tpu.matmul %8, %6, %cst_7 {dimension_numbers = #tpu.dot_dimension_numbers<[1], [0], [0], [1], [0, 0, 1, 1], [], []>} : vector<128x128xbf16>, vector<128x128xbf16>, vector<128x128xf32> -> vector<128x128xf32>
    %c0_8 = arith.constant 0 : index
    %c0_9 = arith.constant 0 : index
    %10 = vector.load %arg4[%c0_8, %c0_9] : memref<128x1xf32, #tpu.memory_space<vmem>>, vector<128x1xf32>
    %11 = vector.broadcast %10 : vector<128x1xf32> to vector<128x128xf32>
    %12 = arith.mulf %9, %11 : vector<128x128xf32>
    %13 = arith.truncf %12 : vector<128x128xf32> to vector<128x128xbf16>
    %c0_10 = arith.constant 0 : index
    %c0_11 = arith.constant 0 : index
    %14 = vector.load %arg5[%c0_10, %c0_11] : memref<128x128xbf16, #tpu.memory_space<vmem>>, vector<128x128xbf16>
    %cst_12 = arith.constant dense<0.000000e+00> : vector<128x128xf32>
    %15 = tpu.matmul %13, %14, %cst_12 {dimension_numbers = #tpu.dot_dimension_numbers<[1], [0], [0], [1], [0, 0, 1, 1], [], []>} : vector<128x128xbf16>, vector<128x128xbf16>, vector<128x128xf32> -> vector<128x128xf32>
    %c0_13 = arith.constant 0 : index
    %c0_14 = arith.constant 0 : index
    %16 = vector.load %arg6[%c0_13, %c0_14] : memref<128x128xbf16, #tpu.memory_space<vmem>>, vector<128x128xbf16>
    %cst_15 = arith.constant dense<0.000000e+00> : vector<128x128xf32>
    %17 = tpu.matmul %6, %16, %cst_15 {dimension_numbers = #tpu.dot_dimension_numbers<[1], [0], [0], [1], [0, 0, 1, 1], [], []>} : vector<128x128xbf16>, vector<128x128xbf16>, vector<128x128xf32> -> vector<128x128xf32>
    %18 = arith.addf %15, %17 : vector<128x128xf32>
    %c0_16 = arith.constant 0 : index
    %c0_17 = arith.constant 0 : index
    %19 = vector.load %arg7[%c0_16, %c0_17] : memref<1x128xf32, #tpu.memory_space<vmem>>, vector<1x128xf32>
    %20 = vector.broadcast %19 : vector<1x128xf32> to vector<128x128xf32>
    %21 = arith.addf %18, %20 : vector<128x128xf32>
    %cst_18 = arith.constant 0.000000e+00 : f32
    %22 = vector.broadcast %cst_18 : f32 to vector<128x128xf32>
    %23 = arith.maximumf %21, %22 : vector<128x128xf32>
    %24 = arith.truncf %23 : vector<128x128xf32> to vector<128x128xbf16>
    %cst_19 = arith.constant dense<0.000000e+00> : vector<128x128xf32>
    %25 = tpu.matmul %8, %24, %cst_19 {dimension_numbers = #tpu.dot_dimension_numbers<[1], [0], [0], [1], [0, 0, 1, 1], [], []>} : vector<128x128xbf16>, vector<128x128xbf16>, vector<128x128xf32> -> vector<128x128xf32>
    %c0_20 = arith.constant 0 : index
    %c0_21 = arith.constant 0 : index
    %26 = vector.load %arg4[%c0_20, %c0_21] : memref<128x1xf32, #tpu.memory_space<vmem>>, vector<128x1xf32>
    %27 = vector.broadcast %26 : vector<128x1xf32> to vector<128x128xf32>
    %28 = arith.mulf %25, %27 : vector<128x128xf32>
    %29 = arith.truncf %28 : vector<128x128xf32> to vector<128x128xbf16>
    %c0_22 = arith.constant 0 : index
    %c0_23 = arith.constant 0 : index
    %30 = vector.load %arg8[%c0_22, %c0_23] : memref<128x128xbf16, #tpu.memory_space<vmem>>, vector<128x128xbf16>
    %cst_24 = arith.constant dense<0.000000e+00> : vector<128x128xf32>
    %31 = tpu.matmul %29, %30, %cst_24 {dimension_numbers = #tpu.dot_dimension_numbers<[1], [0], [0], [1], [0, 0, 1, 1], [], []>} : vector<128x128xbf16>, vector<128x128xbf16>, vector<128x128xf32> -> vector<128x128xf32>
    %c0_25 = arith.constant 0 : index
    %c0_26 = arith.constant 0 : index
    %32 = vector.load %arg9[%c0_25, %c0_26] : memref<128x128xbf16, #tpu.memory_space<vmem>>, vector<128x128xbf16>
    %cst_27 = arith.constant dense<0.000000e+00> : vector<128x128xf32>
    %33 = tpu.matmul %24, %32, %cst_27 {dimension_numbers = #tpu.dot_dimension_numbers<[1], [0], [0], [1], [0, 0, 1, 1], [], []>} : vector<128x128xbf16>, vector<128x128xbf16>, vector<128x128xf32> -> vector<128x128xf32>
    %34 = arith.addf %31, %33 : vector<128x128xf32>
    %c0_28 = arith.constant 0 : index
    %c0_29 = arith.constant 0 : index
    %35 = vector.load %arg10[%c0_28, %c0_29] : memref<1x128xf32, #tpu.memory_space<vmem>>, vector<1x128xf32>
    %36 = vector.broadcast %35 : vector<1x128xf32> to vector<128x128xf32>
    %37 = arith.addf %34, %36 : vector<128x128xf32>
    %cst_30 = arith.constant 0.000000e+00 : f32
    %38 = vector.broadcast %cst_30 : f32 to vector<128x128xf32>
    %39 = arith.maximumf %37, %38 : vector<128x128xf32>
    %40 = arith.truncf %39 : vector<128x128xf32> to vector<128x128xbf16>
    %c0_31 = arith.constant 0 : index
    %c0_32 = arith.constant 0 : index
    %41 = vector.load %arg11[%c0_31, %c0_32] : memref<8x128xbf16, #tpu.memory_space<vmem>>, vector<8x128xbf16>
    %cst_33 = arith.constant dense<0.000000e+00> : vector<8x128xf32>
    %42 = tpu.matmul %41, %40, %cst_33 {dimension_numbers = #tpu.dot_dimension_numbers<[1], [0], [0], [1], [0, 0, 1, 1], [], []>} : vector<8x128xbf16>, vector<128x128xbf16>, vector<8x128xf32> -> vector<8x128xf32>
    %c0_34 = arith.constant 0 : index
    %c0_35 = arith.constant 0 : index
    %43 = vector.load %arg12[%c0_34, %c0_35] : memref<8x1xf32, #tpu.memory_space<vmem>>, vector<8x1xf32>
    %44 = vector.broadcast %43 : vector<8x1xf32> to vector<8x128xf32>
    %45 = arith.mulf %42, %44 : vector<8x128xf32>
    %46 = arith.truncf %45 : vector<8x128xf32> to vector<8x128xbf16>
    %c0_36 = arith.constant 0 : index
    %c0_37 = arith.constant 0 : index
    %47 = vector.load %arg13[%c0_36, %c0_37] : memref<128x128xbf16, #tpu.memory_space<vmem>>, vector<128x128xbf16>
    %cst_38 = arith.constant dense<0.000000e+00> : vector<8x128xf32>
    %48 = tpu.matmul %46, %47, %cst_38 {dimension_numbers = #tpu.dot_dimension_numbers<[1], [0], [0], [1], [0, 0, 1, 1], [], []>} : vector<8x128xbf16>, vector<128x128xbf16>, vector<8x128xf32> -> vector<8x128xf32>
    %c0_39 = arith.constant 0 : index
    %c0_40 = arith.constant 0 : index
    %49 = vector.load %arg14[%c0_39, %c0_40] : memref<1x128xf32, #tpu.memory_space<vmem>>, vector<1x128xf32>
    %50 = vector.broadcast %49 : vector<1x128xf32> to vector<8x128xf32>
    %51 = arith.addf %48, %50 : vector<8x128xf32>
    %c0_41 = arith.constant 0 : index
    %c0_42 = arith.constant 0 : index
    %52 = vector.load %arg15[%c0_41, %c0_42] : memref<8x128xf32, #tpu.memory_space<vmem>>, vector<8x128xf32>
    tpu.vector_store %arg15[%c0_41, %c0_42], %51 {strides = array<i32>} : memref<8x128xf32, #tpu.memory_space<vmem>>, vector<8x128xf32>,
    return
  }
}

</mosaic_0001>

<bundles_post_ra>
// kernel: tpu_custom_call.1
= control target key start
LH: loop header
LB: loop body
LE: loop exit
PB: predicated region body
PF: predicated region fallthrough
CT: control target
= control target key end

     0   :  { %20 = vsyncpa [#allocation3], 0  ;;  %s2928_s0 = inlined_call_operand.vmem [shape: bf16[128,128], index: 0, kind: input, shape index: {}]   ;;  %s2929_s1 = inlined_call_operand.vmem [shape: f32[128,1], index: 1, kind: input, shape index: {}]   ;;  %s2930_s2 = inlined_call_operand.vmem [shape: bf16[128,128], index: 2, kind: input, shape index: {}]   ;;  %s2931_s3 = inlined_call_operand.hbm [shape: s8[128,128], index: 3, kind: input, shape index: {}]   ;;  %s2932_s4 = inlined_call_operand.vmem [shape: f32[128,1], index: 4, kind: input, shape index: {}]   ;;  %s2933_s5 = inlined_call_operand.vmem [shape: bf16[128,128], index: 5, kind: input, shape index: {}]   ;;  %s2934_s6 = inlined_call_operand.vmem [shape: bf16[128,128], index: 6, kind: input, shape index: {}]   ;;  %s2935_s7 = inlined_call_operand.vmem [shape: f32[1,128], index: 7, kind: input, shape index: {}]   ;;  %s2936_s8 = inlined_call_operand.hbm [shape: bf16[128,128], index: 8, kind: input, shape index: {}]   ;;  %s2937_s9 = inlined_call_operand.hbm [shape: bf16[128,128], index: 9, kind: input, shape index: {}]   ;;  %s2938_s10 = inlined_call_operand.vmem [shape: f32[1,128], index: 10, kind: input, shape index: {}]   ;;  %s2939_s11 = inlined_call_operand.vmem [shape: bf16[8,128], index: 11, kind: input, shape index: {}]   ;;  %s2940_s12 = inlined_call_operand.vmem [shape: f32[8,1], index: 12, kind: input, shape index: {}]   ;;  %s2941_s13 = inlined_call_operand.hbm [shape: bf16[128,128], index: 13, kind: input, shape index: {}]   ;;  %s2942_s14 = inlined_call_operand.vmem [shape: f32[1,128], index: 14, kind: input, shape index: {}]   ;;  %s2943_s15 = inlined_call_operand.hbm [shape: f32[8,128], index: 15, kind: output, shape index: {}]  }
   0x1   :  { %21 = vsyncpa [#allocation6], 0 }
   0x2   :  { %22 = vsyncpa [#allocation9], 0 }
   0x3   :  { %23 = vsyncpa [#allocation4], 0  ;;  %s2391_s18 = smov [#allocation5]   ;;  %s2273_s22 = scalar_lea.hbm %s2936_s8, 1024 }
   0x4   :  { %s55_s19 = sshll.u32 %s2391_s18, 4  ;;  %p2274_p0 = scmp.ne.s32.totalorder %s2936_s8, %s2273_s22  ;;  %s56_s19 = int_to_ptr.vmem [resolvable:$true] %s55_s19 }
   0x5   :  { %p2277_p1 = scmp.lt.u32.totalorder %s2273_s22, %s2936_s8 }
   0x7   :  { %p2279_p2 = pnand %p2277_p1, %p2274_p0 }
   0x9   :  { %2282 = shalt.err (!%p2279_p2)
}
   0xa   :  { %s2283_s27 = scalar_lea.vmem %s56_s19, 1024  ;;  %p2288_p4 = scmp.lt.s32.totalorder %s56_s19, %s56_s19 }
   0xb   :  { %p2284_p3 = scmp.ne.s32.totalorder %s56_s19, %s2283_s27  ;;  %p2289_p5 = scmp.lt.s32.totalorder %s2283_s27, %s2283_s27 }
   0xd   :  { %p2290_p6 = por %p2289_p5, %p2288_p4 }
   0xf   :  { %p2291_p7 = pnand %p2290_p6, %p2284_p3 }
  0x11   :  { %2294 = shalt.err (!%p2291_p7)
}
  0x12   :  { %s2944_s28 = smov 64   ;;  %s2946_s29 = smov 4  }
  0x13   :  { %61 = dma.hbm_to_vmem [thread:$0]  %s2936_s8, 1024, %s56_s19, [#allocation6], %s2944_s28, %s2944_s28, %s2946_s29  }
  0x14   :  { %s2394_s17 = smov [#allocation2]   ;;  %s2295_s22 = scalar_lea.hbm %s2931_s3, 512 }
  0x15   :  { %s35_s18 = sshll.u32 %s2394_s17, 4  ;;  %p2296_p8 = scmp.ne.s32.totalorder %s2931_s3, %s2295_s22  ;;  %s36_s18 = int_to_ptr.vmem [resolvable:$true] %s35_s18 }
  0x16   :  { %p2299_p9 = scmp.lt.u32.totalorder %s2295_s22, %s2931_s3 }
  0x18   :  { %p2301_p10 = pnand %p2299_p9, %p2296_p8 }
  0x1a   :  { %2304 = shalt.err (!%p2301_p10)
}
  0x1b   :  { %s2305_s27 = scalar_lea.vmem %s36_s18, 512  ;;  %p2310_p12 = scmp.lt.s32.totalorder %s36_s18, %s36_s18 }
  0x1c   :  { %p2306_p11 = scmp.ne.s32.totalorder %s36_s18, %s2305_s27  ;;  %p2311_p13 = scmp.lt.s32.totalorder %s2305_s27, %s2305_s27 }
  0x1e   :  { %p2312_p0 = por %p2311_p13, %p2310_p12 }
  0x20   :  { %p2313_p1 = pnand %p2312_p0, %p2306_p11 }
  0x22   :  { %2316 = shalt.err (!%p2313_p1)
}
  0x23   :  { %s2395_s8 = smov 128   ;;  %s2396_s19 = smov 8  }
  0x24   :  { %41 = dma.hbm_to_vmem [thread:$0]  %s2931_s3, 512, %s36_s18, [#allocation3], %s2395_s8, %s2395_s8, %s2396_s19  }
  0x25   :  { %s2397_s17 = smov [#allocation7]   ;;  %s2398_s21 = smov [#allocation8]  }
  0x26   :  { %s67_s20 = sshll.u32 %s2397_s17, 4  ;;  %s85_s23 = sshll.u32 %s2398_s21, 4  ;;  %s68_s20 = int_to_ptr.vmem [resolvable:$true] %s67_s20  ;;  %s2510_s23 = int_to_ptr.vmem [resolvable:$true] %s85_s23 }
  0x27   :  { %s2317_s25 = scalar_lea.hbm %s2937_s9, 1024 }
  0x28   :  { %p2318_p2 = scmp.ne.s32.totalorder %s2937_s9, %s2317_s25  ;;  %p2321_p3 = scmp.lt.u32.totalorder %s2317_s25, %s2937_s9 }
  0x2a   :  { %p2323_p4 = pnand %p2321_p3, %p2318_p2 }
  0x2c   :  { %2326 = shalt.err (!%p2323_p4)
}
  0x2d   :  { %s2327_s3 = scalar_lea.vmem %s68_s20, 1024  ;;  %p2332_p6 = scmp.lt.s32.totalorder %s68_s20, %s68_s20 }
  0x2e   :  { %p2328_p5 = scmp.ne.s32.totalorder %s68_s20, %s2327_s3  ;;  %p2333_p7 = scmp.lt.s32.totalorder %s2327_s3, %s2327_s3 }
  0x30   :  { %p2334_p8 = por %p2333_p7, %p2332_p6 }
  0x32   :  { %p2335_p9 = pnand %p2334_p8, %p2328_p5 }
  0x34   :  { %2338 = shalt.err (!%p2335_p9)
}
  0x35   :  { %s2948_s18 = smov 4   ;;  %s2949_s8 = smov 64  }
  0x36   :  { %73 = dma.hbm_to_vmem [thread:$0]  %s2937_s9, 1024, %s68_s20, [#allocation6], %s2949_s8, %s2949_s8, %s2948_s18  }
  0x37   :  { %s2339_s28 = scalar_lea.hbm %s2941_s13, 1024 }
  0x38   :  { %p2340_p10 = scmp.ne.s32.totalorder %s2941_s13, %s2339_s28  ;;  %p2343_p11 = scmp.lt.u32.totalorder %s2339_s28, %s2941_s13 }
  0x3a   :  { %p2345_p12 = pnand %p2343_p11, %p2340_p10 }
  0x3c   :  { %2348 = shalt.err (!%p2345_p12)
}
  0x3d   :  { %s2349_s25 = scalar_lea.vmem %s2510_s23, 1024  ;;  %p2354_p0 = scmp.lt.s32.totalorder %s2510_s23, %s2510_s23 }
  0x3e   :  { %p2350_p13 = scmp.ne.s32.totalorder %s2510_s23, %s2349_s25  ;;  %p2355_p1 = scmp.lt.s32.totalorder %s2349_s25, %s2349_s25 }
  0x40   :  { %p2356_p2 = por %p2355_p1, %p2354_p0 }
  0x42   :  { %p2357_p3 = pnand %p2356_p2, %p2350_p13 }
  0x44   :  { %2360 = shalt.err (!%p2357_p3)
}
  0x45   :  { %91 = dma.hbm_to_vmem [thread:$0]  %s2941_s13, 1024, %s2510_s23, [#allocation9], %s2949_s8, %s2949_s8, %s2948_s18  }
  0x46   :  { %2383 = dma.done.wait [#allocation3], 512  }
  0x47   :  { %2384 = vsyncadd [#allocation3], 4294966784 }
  0x48   :  { %2385 = dma.done.wait [#allocation6], 2048  }
  0x49   :  { %2386 = vsyncadd [#allocation6], 4294965248 }
  0x4a   :  { %2387 = dma.done.wait [#allocation9], 1024  }
  0x4b   :  { %2388 = vsyncadd [#allocation9], 4294966272  ;;  %v2399_v0 = vmov 0   ;;  %v2217_v1 = vld [vmem:[%s2930_s2] sm:$0xff]   ;;  %v2218_v2 = vld [vmem:[%s2930_s2 + $0x8] sm:$0xff]   ;;  %vm2401_vm0 = vmmov 0  }
  0x4c   :  { %2215 = vset.pattern.permute.xlu0 %v2399_v0  ;;  %2216 = vset.pattern.permute.xlu1 %v2399_v0  ;;  %v2219_v3 = vld [vmem:[%s2930_s2 + $0x10] sm:$0xff]   ;;  %v2220_v4 = vld [vmem:[%s2930_s2 + $0x18] sm:$0xff]   ;;  %v2225_v5 = vld [vmem:[%s2928_s0] sm:$0xff]   ;;  %s2402_s18 = smov [#allocation10]  }
  0x4d   :  { %1907 = vmatprep.subr.bf16.mxu0 %v2217_v1  ;;  %1923 = vmatprep.mubr.bf16.mxu0 %v2225_v5  ;;  %v2221_v6 = vld [vmem:[%s2930_s2 + $0x20] sm:$0xff]   ;;  %v2222_v8 = vld [vmem:[%s2930_s2 + $0x28] sm:$0xff]   ;;  %v334_v10 = vld [vmem:[%s2929_s1 + $0x10] sm:$0xff] }
  0x4e   :  { %1908 = vmatpush3.bf16.msra.mxu0 %v2217_v1  ;;  %v332_v7 = vld [vmem:[%s2929_s1] sm:$0xff]  ;;  %v333_v9 = vld [vmem:[%s2929_s1 + $0x8] sm:$0xff]  ;;  %360 = vperm.xlu1 %2216, %v334_v10   ;;  %v335_v11 = vld [vmem:[%s2929_s1 + $0x18] sm:$0xff] }
  0x4f   :  { %1909 = vmatprep.subr.bf16.mxu0 %v2218_v2  ;;  %350 = vperm.xlu0 %2215, %v332_v7   ;;  %v2223_v12 = vld [vmem:[%s2930_s2 + $0x30] sm:$0xff]   ;;  %v336_v13 = vld [vmem:[%s2929_s1 + $0x20] sm:$0xff]  ;;  %v337_v14 = vld [vmem:[%s2929_s1 + $0x28] sm:$0xff] }
  0x50   :  { %v2224_v15 = vld [vmem:[%s2930_s2 + $0x38] sm:$0xff]   ;;  %v338_v16 = vld [vmem:[%s2929_s1 + $0x30] sm:$0xff]  ;;  %v340_v17 = vld [vmem:[%s2929_s1 + $0x40] sm:$0xff] }
  0x51   :  { %v339_v18 = vld [vmem:[%s2929_s1 + $0x38] sm:$0xff]  ;;  %v2226_v19 = vld [vmem:[%s2928_s0 + $0x8] sm:$0xff]   ;;  %v2227_v21 = vld [vmem:[%s2928_s0 + $0x10] sm:$0xff]  }
  0x52   :  { %1910 = vmatpush3.bf16.msra.mxu0 %v2218_v2  ;;  %365 = vperm.xlu1 %2216, %v335_v11   ;;  %v341_v20 = vld [vmem:[%s2929_s1 + $0x48] sm:$0xff]  ;;  %v342_v22 = vld [vmem:[%s2929_s1 + $0x50] sm:$0xff]  ;;  %v343_v23 = vld [vmem:[%s2929_s1 + $0x58] sm:$0xff] }
  0x53   :  { %1911 = vmatprep.subr.bf16.mxu0 %v2219_v3  ;;  %355 = vperm.xlu0 %2215, %v333_v9   ;;  %v344_v24 = vld [vmem:[%s2929_s1 + $0x60] sm:$0xff]  ;;  %v2228_v25 = vld [vmem:[%s2928_s0 + $0x18] sm:$0xff]   ;;  %v345_v26 = vld [vmem:[%s2929_s1 + $0x68] sm:$0xff] }
  0x54   :  { %v2229_v27 = vld [vmem:[%s2928_s0 + $0x20] sm:$0xff]   ;;  %v346_v28 = vld [vmem:[%s2929_s1 + $0x70] sm:$0xff]  ;;  %v347_v29 = vld [vmem:[%s2929_s1 + $0x78] sm:$0xff]  ;;  %s1707_s1 = sshll.u32 %s2402_s18, 4  ;;  %s1708_s1 = int_to_ptr.vmem [resolvable:$true] %s1707_s1 }
  0x55   :  { %v561_v30 = vld [vmem:[%s2932_s4] sm:$0xff]  ;;  %v2230_v31 = vld [vmem:[%s2928_s0 + $0x28] sm:$0xff]   ;;  %v2231_v33 = vld [vmem:[%s2928_s0 + $0x30] sm:$0xff]   ;;  %s2361_s8 = scalar_lea.vmem %s1708_s1, 128  ;;  %p2366_p5 = scmp.lt.s32.totalorder %s1708_s1, %s1708_s1 }
  0x56   :  { %1912 = vmatpush3.bf16.msra.mxu0 %v2219_v3  ;;  %375 = vperm.xlu1 %2216, %v337_v14   ;;  %v562_v32 = vld [vmem:[%s2932_s4 + $0x8] sm:$0xff]  ;;  %v563_v34 = vld [vmem:[%s2932_s4 + $0x10] sm:$0xff]  ;;  %v564_v35 = vld [vmem:[%s2932_s4 + $0x18] sm:$0xff]  ;;  %p2362_p4 = scmp.ne.s32.totalorder %s1708_s1, %s2361_s8  ;;  %p2367_p6 = scmp.lt.s32.totalorder %s2361_s8, %s2361_s8 }
  0x57   :  { %1913 = vmatprep.subr.bf16.mxu0 %v2220_v4  ;;  %370 = vperm.xlu0 %2215, %v336_v13   ;;  %v565_v36 = vld [vmem:[%s2932_s4 + $0x20] sm:$0xff]  ;;  %v2232_v37 = vld [vmem:[%s2928_s0 + $0x38] sm:$0xff]   ;;  %v566_v38 = vld [vmem:[%s2932_s4 + $0x28] sm:$0xff] }
  0x58   :  { %v2233_v39 = vld [vmem:[%s2934_s6] sm:$0xff]   ;;  %v567_v40 = vld [vmem:[%s2932_s4 + $0x30] sm:$0xff]  ;;  %v568_v41 = vld [vmem:[%s2932_s4 + $0x38] sm:$0xff]  ;;  %p2368_p7 = por %p2367_p6, %p2366_p5 }
  0x59   :  { %v2234_v42 = vld [vmem:[%s2934_s6 + $0x8] sm:$0xff]   ;;  %v569_v43 = vld [vmem:[%s2932_s4 + $0x40] sm:$0xff]  ;;  %v2235_v45 = vld [vmem:[%s2934_s6 + $0x10] sm:$0xff]  }
  0x5a   :  { %1914 = vmatpush3.bf16.msra.mxu0 %v2220_v4  ;;  %385 = vperm.xlu1 %2216, %v339_v18   ;;  %v570_v44 = vld [vmem:[%s2932_s4 + $0x48] sm:$0xff]  ;;  %v571_v46 = vld [vmem:[%s2932_s4 + $0x50] sm:$0xff]  ;;  %v572_v47 = vld [vmem:[%s2932_s4 + $0x58] sm:$0xff]  ;;  %p2369_p8 = pnand %p2368_p7, %p2362_p4 }
  0x5b   :  { %1915 = vmatprep.subr.bf16.mxu0 %v2221_v6  ;;  %380 = vperm.xlu0 %2215, %v338_v16   ;;  %v2236_v48 = vld [vmem:[%s2934_s6 + $0x18] sm:$0xff]   ;;  %v573_v49 = vld [vmem:[%s2932_s4 + $0x60] sm:$0xff]  ;;  %v574_v50 = vld [vmem:[%s2932_s4 + $0x68] sm:$0xff] }
  0x5c   :  { %v2237_v51 = vld [vmem:[%s2934_s6 + $0x20] sm:$0xff]   ;;  %v575_v52 = vld [vmem:[%s2932_s4 + $0x70] sm:$0xff]  ;;  %v576_v53 = vld [vmem:[%s2932_s4 + $0x78] sm:$0xff] }
  0x5d   :  { %v2238_v54 = vld [vmem:[%s2934_s6 + $0x28] sm:$0xff]   ;;  %v1581_v55 = vld [vmem:[%s2940_s12] sm:$0xff]  ;;  %v2239_v56 = vld [vmem:[%s2934_s6 + $0x30] sm:$0xff]  }
  0x5e   :  { %1916 = vmatpush3.bf16.msra.mxu0 %v2221_v6  ;;  %395 = vperm.xlu1 %2216, %v341_v20   ;;  %v2240_v57 = vld [vmem:[%s2934_s6 + $0x38] sm:$0xff]   ;;  %v2718_v58 = vld [vmem:[#allocation2] sm:$0xff]  ;;  %v2242_v16 = vld [vmem:[%s2933_s5 + $0x8] sm:$0xff]  }
  0x5f   :  { %1917 = vmatprep.subr.bf16.mxu0 %v2222_v8  ;;  %390 = vperm.xlu0 %2215, %v340_v17   ;;  %v456_v59 = vunpack.c.l.s8.bf16 %v2718_v58  ;;  %v2241_v60 = vld [vmem:[%s2933_s5] sm:$0xff]  }
  0x61   :  { %1955 = vmatprep.mubr.bf16.mxu1 %v456_v59 }
  0x62   :  { %1918 = vmatpush3.bf16.msra.mxu0 %v2222_v8  ;;  %405 = vperm.xlu1 %2216, %v343_v23  }
  0x63   :  { %1919 = vmatprep.subr.bf16.mxu0 %v2223_v12  ;;  %400 = vperm.xlu0 %2215, %v342_v22  }
  0x66   :  { %1920 = vmatpush3.bf16.msra.mxu0 %v2223_v12  ;;  %415 = vperm.xlu1 %2216, %v345_v26  }
  0x67   :  { %1921 = vmatprep.subr.bf16.mxu0 %v2224_v15  ;;  %410 = vperm.xlu0 %2215, %v344_v24   ;;  %v2243_v24 = vld [vmem:[%s2933_s5 + $0x10] sm:$0xff]  }
  0x6a   :  { %1922 = vmatpush3.bf16.msra.mxu0 %v2224_v15  ;;  %425 = vperm.xlu1 %2216, %v347_v29  }
  0x6b   :  { %420 = vperm.xlu0 %2215, %v346_v28   ;;  %1971 = vmatprep.subr.bf16.mxu0 %v2233_v39 }
  0x6d   :  { %1924 = vmatmul.mubr.bf16.vlgmr.msra.gmra.mrb[0].mxu0 %v2226_v19 }
  0x6e   :  { %1927 = vmatprep.mubr.bf16.mxu0 %v2227_v21  ;;  %584 = vperm.xlu1 %2216, %v562_v32  }
  0x6f   :  { %579 = vperm.xlu0 %2215, %v561_v30   ;;  %1972 = vmatpush3.bf16.msra.mxu0 %v2233_v39  ;;  %v2245_v39 = vld [vmem:[%s2933_s5 + $0x20] sm:$0xff]  }
  0x70   :  { %1973 = vmatprep.subr.bf16.mxu0 %v2234_v42 }
  0x72   :  { %594 = vperm.xlu1 %2216, %v564_v35  }
  0x73   :  { %589 = vperm.xlu0 %2215, %v563_v34   ;;  %1974 = vmatpush3.bf16.msra.mxu0 %v2234_v42 }
  0x74   :  { %1975 = vmatprep.subr.bf16.mxu0 %v2235_v45 }
  0x75   :  { %1928 = vmatmul.mubr.bf16.gmra.mrb[4].mxu0 %v2228_v25 }
  0x76   :  { %1931 = vmatprep.mubr.bf16.mxu0 %v2229_v27  ;;  %604 = vperm.xlu1 %2216, %v566_v38  }
  0x77   :  { %599 = vperm.xlu0 %2215, %v565_v36   ;;  %1976 = vmatpush3.bf16.msra.mxu0 %v2235_v45  ;;  %v2246_v45 = vld [vmem:[%s2933_s5 + $0x28] sm:$0xff]  }
  0x78   :  { %1977 = vmatprep.subr.bf16.mxu0 %v2236_v48 }
  0x7a   :  { %614 = vperm.xlu1 %2216, %v568_v41  }
  0x7b   :  { %609 = vperm.xlu0 %2215, %v567_v40   ;;  %1978 = vmatpush3.bf16.msra.mxu0 %v2236_v48 }
  0x7c   :  { %1979 = vmatprep.subr.bf16.mxu0 %v2237_v51 }
  0x7d   :  { %1932 = vmatmul.mubr.bf16.gmra.mrb[8].mxu0 %v2230_v31  ;;  %v2244_v31 = vld [vmem:[%s2933_s5 + $0x18] sm:$0xff]  }
  0x7e   :  { %1935 = vmatprep.mubr.bf16.mxu0 %v2231_v33  ;;  %624 = vperm.xlu1 %2216, %v570_v44  }
  0x7f   :  { %619 = vperm.xlu0 %2215, %v569_v43   ;;  %1980 = vmatpush3.bf16.msra.mxu0 %v2237_v51 }
  0x80   :  { %1981 = vmatprep.subr.bf16.mxu0 %v2238_v54 }
  0x82   :  { %634 = vperm.xlu1 %2216, %v572_v47  }
  0x83   :  { %629 = vperm.xlu0 %2215, %v571_v46   ;;  %1982 = vmatpush3.bf16.msra.mxu0 %v2238_v54 }
  0x84   :  { %1983 = vmatprep.subr.bf16.mxu0 %v2239_v56 }
  0x85   :  { %1936 = vmatmul.mubr.bf16.gmra.mrb[12].mxu0 %v2232_v37 }
  0x86   :  { %644 = vperm.xlu1 %2216, %v574_v50  }
  0x87   :  { %639 = vperm.xlu0 %2215, %v573_v49   ;;  %1984 = vmatpush3.bf16.msra.mxu0 %v2239_v56 }
  0x88   :  { %1985 = vmatprep.subr.bf16.mxu0 %v2240_v57 }
  0x8a   :  { %654 = vperm.xlu1 %2216, %v576_v53  }
  0x8b   :  { %649 = vperm.xlu0 %2215, %v575_v52   ;;  %1986 = vmatpush3.bf16.msra.mxu0 %v2240_v57 }
  0x8c   :  { %2003 = vmatprep.subr.bf16.mxu0 %v2241_v60 }
  0x8f   :  { %1584 = vperm.xlu0 %2215, %v1581_v55  }
  0xcd   :  { %v361_v62 = vpop.permute.xlu1 %360 }
  0xce   :  { %v351_v61 = vpop.permute.xlu0 %350 }
  0xd1   :  { %v366_v0 = vpop.permute.xlu1 %365 }
  0xd2   :  { %v356_v63 = vpop.permute.xlu0 %355 }
  0xd5   :  { %v376_v2 = vpop.permute.xlu1 %375 }
  0xd6   :  { %v371_v1 = vpop.permute.xlu0 %370 }
  0xd9   :  { %v386_v6 = vpop.permute.xlu1 %385 }
  0xda   :  { %v381_v4 = vpop.permute.xlu0 %380 }
  0xdd   :  { %v396_v17 = vpop.permute.xlu1 %395 }
  0xde   :  { %v391_v15 = vpop.permute.xlu0 %390 }
  0xe1   :  { %v406_v29 = vpop.permute.xlu1 %405 }
  0xe2   :  { %v401_v27 = vpop.permute.xlu0 %400 }
  0xe5   :  { %v416_v40 = vpop.permute.xlu1 %415 }
  0xe6   :  { %v411_v35 = vpop.permute.xlu0 %410 }
  0xe9   :  { %v426_v49 = vpop.permute.xlu1 %425 }
  0xea   :  { %v421_v47 = vpop.permute.xlu0 %420 }
 0x140   :  { %v1925_v3 = vpop.f32.mrb[0].mxu0 }
 0x141   :  { %v269_v5 = vpop.f32.mrb[1].mxu0  ;;  %v430_v8 = vmul.f32 %v1925_v3, %v361_v62 }
 0x142   :  { %v1926_v7 = vpop.f32.mrb[2].mxu0  ;;  %v428_v11 = vmul.f32 %v351_v61, %v269_v5  ;;  %v457_v61 = vunpack.c.h.s8.bf16 %v2718_v58  ;;  %v2254_v58 = vld [vmem:[#allocation7 + $0x28] sm:$0xff]  }
 0x143   :  { %v431_v9 = vmul.f32 %v1926_v7, %v366_v0  ;;  %v272_v10 = vpop.f32.mrb[3].mxu0  ;;  %v2248_v7 = vld [vmem:[%s2933_s5 + $0x38] sm:$0xff]  }
 0x144   :  { %v429_v12 = vmul.f32 %v356_v63, %v272_v10  ;;  %v2749_v63 = vld [vmem:[#allocation2 + $0x10] sm:$0xff] }
 0x145   :  { %v445_v13 = vpack.c.bf16 %v431_v9, %v430_v8  ;;  %v461_v3 = vunpack.c.h.s8.bf16 %v2749_v63  ;;  %v2776_v8 = vpop.permute.xlu0 %579  ;;  %v2778_v9 = vpop.permute.xlu1 %584 }
 0x146   :  { %v444_v14 = vpack.c.bf16 %v429_v12, %v428_v11 }
 0x148   :  { %v1929_v18 = vpop.f32.mrb[4].mxu0  ;;  %1939 = vmatprep.subr.bf16.mxu1 %v444_v14  ;;  %1987 = vmatprep.mubr.bf16.mxu0 %v444_v14 }
 0x149   :  { %v285_v19 = vpop.f32.mrb[5].mxu0  ;;  %1940 = vmatpush3.bf16.msra.mxu1 %v444_v14  ;;  %1988 = vmatmul.mubr.bf16.vlgmr.msra.gmra.mrb[16].mxu0 %v445_v13  ;;  %v434_v21 = vmul.f32 %v1929_v18, %v381_v4  ;;  %v2780_v10 = vpop.permute.xlu0 %589 }
 0x14a   :  { %v1930_v20 = vpop.f32.mrb[6].mxu0  ;;  %1941 = vmatprep.subr.bf16.mxu1 %v445_v13  ;;  %2004 = vmatpush3.bf16.msra.mxu0 %v2241_v60  ;;  %v432_v25 = vmul.f32 %v371_v1, %v285_v19  ;;  %v2741_v60 = vld [vmem:[#allocation2 + $0x8] sm:$0xff]  ;;  %v460_v1 = vunpack.c.l.s8.bf16 %v2749_v63  ;;  %v2782_v11 = vpop.permute.xlu1 %594 }
 0x14b   :  { %v435_v22 = vmul.f32 %v1930_v20, %v386_v6  ;;  %v288_v23 = vpop.f32.mrb[7].mxu0  ;;  %2005 = vmatprep.subr.bf16.mxu0 %v2242_v16  ;;  %v458_v62 = vunpack.c.l.s8.bf16 %v2741_v60  ;;  %v459_v0 = vunpack.c.h.s8.bf16 %v2741_v60  ;;  %v2247_v6 = vld [vmem:[%s2933_s5 + $0x30] sm:$0xff]   ;;  %v2256_v60 = vld [vmem:[#allocation7 + $0x38] sm:$0xff]   ;;  %v2258_v63 = vld [vmem:[#allocation5 + $0x8] sm:$0xff]  }
 0x14c   :  { %v433_v26 = vmul.f32 %v376_v2, %v288_v23  ;;  %v2757_v2 = vld [vmem:[#allocation2 + $0x18] sm:$0xff] }
 0x14d   :  { %v447_v28 = vpack.c.bf16 %v435_v22, %v434_v21  ;;  %1942 = vmatpush3.bf16.msra.mxu1 %v445_v13  ;;  %v462_v4 = vunpack.c.l.s8.bf16 %v2757_v2  ;;  %v463_v5 = vunpack.c.h.s8.bf16 %v2757_v2  ;;  %v2261_v2 = vld [vmem:[#allocation5 + $0x20] sm:$0xff]  }
 0x14e   :  { %v446_v30 = vpack.c.bf16 %v433_v26, %v432_v25  ;;  %2006 = vmatpush3.bf16.msra.mxu0 %v2242_v16  ;;  %v2786_v12 = vpop.permute.xlu1 %604 }
 0x14f   :  { %2007 = vmatprep.subr.bf16.mxu0 %v2243_v24 }
 0x150   :  { %v1933_v32 = vpop.f32.mrb[8].mxu0  ;;  %1943 = vmatprep.subr.bf16.mxu1 %v446_v30  ;;  %1991 = vmatprep.mubr.bf16.mxu0 %v446_v30 }
 0x151   :  { %v301_v33 = vpop.f32.mrb[9].mxu0  ;;  %1944 = vmatpush3.bf16.msra.mxu1 %v446_v30  ;;  %1992 = vmatmul.mubr.bf16.gmra.mrb[20].mxu0 %v447_v28  ;;  %v438_v36 = vmul.f32 %v1933_v32, %v401_v27 }
 0x152   :  { %v1934_v34 = vpop.f32.mrb[10].mxu0  ;;  %1945 = vmatprep.subr.bf16.mxu1 %v447_v28  ;;  %2008 = vmatpush3.bf16.msra.mxu0 %v2243_v24  ;;  %v436_v41 = vmul.f32 %v391_v15, %v301_v33  ;;  %v2790_v16 = vpop.permute.xlu1 %614 }
 0x153   :  { %v439_v37 = vmul.f32 %v1934_v34, %v406_v29  ;;  %v304_v38 = vpop.f32.mrb[11].mxu0  ;;  %2009 = vmatprep.subr.bf16.mxu0 %v2244_v31 }
 0x154   :  { %v437_v42 = vmul.f32 %v396_v17, %v304_v38 }
 0x155   :  { %v449_v43 = vpack.c.bf16 %v439_v37, %v438_v36  ;;  %1946 = vmatpush3.bf16.msra.mxu1 %v447_v28 }
 0x156   :  { %v448_v44 = vpack.c.bf16 %v437_v42, %v436_v41  ;;  %2010 = vmatpush3.bf16.msra.mxu0 %v2244_v31  ;;  %v2798_v26 = vpop.permute.xlu1 %624 }
 0x157   :  { %2011 = vmatprep.subr.bf16.mxu0 %v2245_v39 }
 0x158   :  { %v1937_v46 = vpop.f32.mrb[12].mxu0  ;;  %1947 = vmatprep.subr.bf16.mxu1 %v448_v44  ;;  %1995 = vmatprep.mubr.bf16.mxu0 %v448_v44 }
 0x159   :  { %v317_v48 = vpop.f32.mrb[13].mxu0  ;;  %1948 = vmatpush3.bf16.msra.mxu1 %v448_v44  ;;  %1996 = vmatmul.mubr.bf16.gmra.mrb[24].mxu0 %v449_v43  ;;  %v442_v51 = vmul.f32 %v1937_v46, %v421_v47 }
 0x15a   :  { %v1938_v50 = vpop.f32.mrb[14].mxu0  ;;  %1949 = vmatprep.subr.bf16.mxu1 %v449_v43  ;;  %2012 = vmatpush3.bf16.msra.mxu0 %v2245_v39  ;;  %v440_v54 = vmul.f32 %v411_v35, %v317_v48  ;;  %v2806_v37 = vpop.permute.xlu1 %634 }
 0x15b   :  { %v443_v52 = vmul.f32 %v1938_v50, %v426_v49  ;;  %v320_v53 = vpop.f32.mrb[15].mxu0  ;;  %2013 = vmatprep.subr.bf16.mxu0 %v2246_v45 }
 0x15c   :  { %v441_v55 = vmul.f32 %v416_v40, %v320_v53 }
 0x15d   :  { %v451_v56 = vpack.c.bf16 %v443_v52, %v442_v51  ;;  %1950 = vmatpush3.bf16.msra.mxu1 %v449_v43 }
 0x15e   :  { %v450_v57 = vpack.c.bf16 %v441_v55, %v440_v54  ;;  %2014 = vmatpush3.bf16.msra.mxu0 %v2246_v45  ;;  %v2812_v46 = vpop.permute.xlu1 %644 }
 0x15f   :  { %2015 = vmatprep.subr.bf16.mxu0 %v2247_v6 }
 0x160   :  { %1951 = vmatprep.subr.bf16.mxu1 %v450_v57  ;;  %1999 = vmatprep.mubr.bf16.mxu0 %v450_v57 }
 0x161   :  { %1952 = vmatpush3.bf16.msra.mxu1 %v450_v57  ;;  %2000 = vmatmul.mubr.bf16.gmra.mrb[28].mxu0 %v451_v56 }
 0x162   :  { %1953 = vmatprep.subr.bf16.mxu1 %v451_v56  ;;  %2016 = vmatpush3.bf16.msra.mxu0 %v2247_v6  ;;  %v2818_v54 = vpop.permute.xlu1 %654 }
 0x163   :  { %2017 = vmatprep.subr.bf16.mxu0 %v2248_v7 }
 0x165   :  { %1954 = vmatpush3.bf16.msra.mxu1 %v451_v56 }
 0x166   :  { %2018 = vmatpush3.bf16.msra.mxu0 %v2248_v7 }
 0x168   :  { %1956 = vmatmul.mubr.bf16.vlgmr.msra.gmra.mrb[0].mxu1 %v457_v61 }
 0x169   :  { %1959 = vmatprep.mubr.bf16.mxu1 %v458_v62 }
 0x170   :  { %1960 = vmatmul.mubr.bf16.gmra.mrb[4].mxu1 %v459_v0 }
 0x171   :  { %1963 = vmatprep.mubr.bf16.mxu1 %v460_v1 }
 0x178   :  { %1964 = vmatmul.mubr.bf16.gmra.mrb[8].mxu1 %v461_v3 }
 0x179   :  { %1967 = vmatprep.mubr.bf16.mxu1 %v462_v4 }
 0x180   :  { %1968 = vmatmul.mubr.bf16.gmra.mrb[12].mxu1 %v463_v5 }
 0x181   :  { %2051 = vmatprep.mubr.bf16.mxu1 %v456_v59  ;;  %v2784_v59 = vpop.permute.xlu0 %599 }
 0x185   :  { %v2788_v14 = vpop.permute.xlu0 %609 }
 0x189   :  { %v2796_v25 = vpop.permute.xlu0 %619 }
 0x18d   :  { %v2804_v35 = vpop.permute.xlu0 %629 }
 0x191   :  { %v2808_v42 = vpop.permute.xlu0 %639 }
 0x195   :  { %v2816_v52 = vpop.permute.xlu0 %649 }
 0x23b   :  { %v1957_v13 = vpop.f32.mrb[0].mxu1 }
 0x23c   :  { %v498_v15 = vpop.f32.mrb[1].mxu1  ;;  %v659_v18 = vmul.f32 %v1957_v13, %v2780_v10 }
 0x23d   :  { %v1958_v17 = vpop.f32.mrb[2].mxu1  ;;  %v657_v21 = vmul.f32 %v2776_v8, %v498_v15 }
 0x23e   :  { %v660_v19 = vmul.f32 %v1958_v17, %v2782_v11  ;;  %v501_v20 = vpop.f32.mrb[3].mxu1 }
 0x23f   :  { %v658_v22 = vmul.f32 %v2778_v9, %v501_v20 }
 0x240   :  { %v674_v23 = vpack.c.bf16 %v660_v19, %v659_v18  ;;  %v1750_v18 = vld [vmem:[%s2935_s7] ss:$0 sm:$0xff] }
 0x241   :  { %v673_v24 = vpack.c.bf16 %v658_v22, %v657_v21 }
 0x243   :  { %v1961_v27 = vpop.f32.mrb[4].mxu1  ;;  %2019 = vmatprep.mubr.bf16.mxu0 %v673_v24 }
 0x244   :  { %v514_v28 = vpop.f32.mrb[5].mxu1  ;;  %2020 = vmatmul.mubr.bf16.vlgmr.msra.gmra.mrb[16].mxu0 %v674_v23  ;;  %v663_v30 = vmul.f32 %v1961_v27, %v2788_v14 }
 0x245   :  { %v1962_v29 = vpop.f32.mrb[6].mxu1  ;;  %v661_v33 = vmul.f32 %v2784_v59, %v514_v28 }
 0x246   :  { %v664_v31 = vmul.f32 %v1962_v29, %v2790_v16  ;;  %v517_v32 = vpop.f32.mrb[7].mxu1 }
 0x247   :  { %v662_v34 = vmul.f32 %v2786_v12, %v517_v32 }
 0x248   :  { %v676_v36 = vpack.c.bf16 %v664_v31, %v663_v30 }
 0x249   :  { %v675_v38 = vpack.c.bf16 %v662_v34, %v661_v33 }
 0x24b   :  { %v1965_v39 = vpop.f32.mrb[8].mxu1  ;;  %2023 = vmatprep.mubr.bf16.mxu0 %v675_v38 }
 0x24c   :  { %v530_v40 = vpop.f32.mrb[9].mxu1  ;;  %2024 = vmatmul.mubr.bf16.gmra.mrb[20].mxu0 %v676_v36  ;;  %v667_v43 = vmul.f32 %v1965_v39, %v2804_v35 }
 0x24d   :  { %v1966_v41 = vpop.f32.mrb[10].mxu1  ;;  %v665_v47 = vmul.f32 %v2796_v25, %v530_v40 }
 0x24e   :  { %v668_v44 = vmul.f32 %v1966_v41, %v2806_v37  ;;  %v533_v45 = vpop.f32.mrb[11].mxu1 }
 0x24f   :  { %v666_v48 = vmul.f32 %v2798_v26, %v533_v45 }
 0x250   :  { %v678_v49 = vpack.c.bf16 %v668_v44, %v667_v43 }
 0x251   :  { %v677_v50 = vpack.c.bf16 %v666_v48, %v665_v47 }
 0x253   :  { %v1969_v51 = vpop.f32.mrb[12].mxu1  ;;  %2027 = vmatprep.mubr.bf16.mxu0 %v677_v50 }
 0x254   :  { %v546_v53 = vpop.f32.mrb[13].mxu1  ;;  %2028 = vmatmul.mubr.bf16.gmra.mrb[24].mxu0 %v678_v49  ;;  %v671_v56 = vmul.f32 %v1969_v51, %v2816_v52 }
 0x255   :  { %v1970_v55 = vpop.f32.mrb[14].mxu1  ;;  %v669_v7 = vmul.f32 %v2808_v42, %v546_v53 }
 0x256   :  { %v672_v57 = vmul.f32 %v1970_v55, %v2818_v54  ;;  %v549_v6 = vpop.f32.mrb[15].mxu1 }
 0x257   :  { %v670_v13 = vmul.f32 %v2812_v46, %v549_v6 }
 0x258   :  { %v680_v15 = vpack.c.bf16 %v672_v57, %v671_v56 }
 0x259   :  { %v679_v17 = vpack.c.bf16 %v670_v13, %v669_v7 }
 0x25b   :  { %2031 = vmatprep.mubr.bf16.mxu0 %v679_v17 }
 0x25c   :  { %2032 = vmatmul.mubr.bf16.gmra.mrb[28].mxu0 %v680_v15 }
 0x317   :  { %v2021_v19 = vpop.f32.mrb[16].mxu0 }
 0x318   :  { %v1012_v20 = vadd.f32 %v2021_v19, %v1750_v18  ;;  %v940_v21 = vpop.f32.mrb[17].mxu0 }
 0x319   :  { %v1010_v22 = vadd.f32 %v1750_v18, %v940_v21  ;;  %v2022_v23 = vpop.f32.mrb[18].mxu0 }
 0x31a   :  { %v1013_v24 = vadd.f32 %v2022_v23, %v1750_v18  ;;  %v943_v27 = vpop.f32.mrb[19].mxu0  ;;  %v1028_v29 = vmax.f32 %v1012_v20, 0.0 }
 0x31b   :  { %v1011_v28 = vadd.f32 %v1750_v18, %v943_v27  ;;  %v1026_v31 = vmax.f32 %v1010_v22, 0.0 }
 0x31c   :  { %v1029_v30 = vmax.f32 %v1013_v24, 0.0 }
 0x31d   :  { %v1027_v32 = vmax.f32 %v1011_v28, 0.0 }
 0x31e   :  { %v2827_v33 = vpack.c.bf16 %v1029_v30, %v1028_v29 }
 0x31f   :  { %v2829_v34 = vpack.c.bf16 %v1027_v32, %v1026_v31  ;;  %v2025_v36 = vpop.f32.mrb[20].mxu0 }
 0x320   :  { %v1016_v38 = vadd.f32 %v2025_v36, %v1750_v18  ;;  %v956_v39 = vpop.f32.mrb[21].mxu0 }
 0x321   :  { %v1014_v40 = vadd.f32 %v1750_v18, %v956_v39  ;;  %v2026_v41 = vpop.f32.mrb[22].mxu0  ;;  %2035 = vmatprep.subr.bf16.mxu1 %v2829_v34 }
 0x322   :  { %v1017_v43 = vadd.f32 %v2026_v41, %v1750_v18  ;;  %v959_v44 = vpop.f32.mrb[23].mxu0  ;;  %2036 = vmatpush3.bf16.msra.mxu1 %v2829_v34  ;;  %v1032_v47 = vmax.f32 %v1016_v38, 0.0 }
 0x323   :  { %v1015_v45 = vadd.f32 %v1750_v18, %v959_v44  ;;  %2037 = vmatprep.subr.bf16.mxu1 %v2827_v33  ;;  %v1030_v49 = vmax.f32 %v1014_v40, 0.0 }
 0x324   :  { %v1033_v48 = vmax.f32 %v1017_v43, 0.0 }
 0x325   :  { %v1031_v50 = vmax.f32 %v1015_v45, 0.0 }
 0x326   :  { %v2834_v51 = vpack.c.bf16 %v1033_v48, %v1032_v47  ;;  %2038 = vmatpush3.bf16.msra.mxu1 %v2827_v33  ;;  %v2249_v47 = vld [vmem:[#allocation7] sm:$0xff]   ;;  %v2250_v48 = vld [vmem:[#allocation7 + $0x8] sm:$0xff]  }
 0x327   :  { %v2837_v53 = vpack.c.bf16 %v1031_v50, %v1030_v49  ;;  %v2029_v55 = vpop.f32.mrb[24].mxu0  ;;  %v2252_v49 = vld [vmem:[#allocation7 + $0x18] sm:$0xff]   ;;  %v2253_v50 = vld [vmem:[#allocation7 + $0x20] sm:$0xff]  }
 0x328   :  { %v1020_v56 = vadd.f32 %v2029_v55, %v1750_v18  ;;  %v972_v57 = vpop.f32.mrb[25].mxu0 }
 0x329   :  { %v1018_v6 = vadd.f32 %v1750_v18, %v972_v57  ;;  %v2030_v7 = vpop.f32.mrb[26].mxu0  ;;  %2039 = vmatprep.subr.bf16.mxu1 %v2837_v53 }
 0x32a   :  { %v1021_v13 = vadd.f32 %v2030_v7, %v1750_v18  ;;  %v975_v15 = vpop.f32.mrb[27].mxu0  ;;  %2040 = vmatpush3.bf16.msra.mxu1 %v2837_v53  ;;  %v1036_v19 = vmax.f32 %v1020_v56, 0.0 }
 0x32b   :  { %v1019_v17 = vadd.f32 %v1750_v18, %v975_v15  ;;  %2041 = vmatprep.subr.bf16.mxu1 %v2834_v51  ;;  %v1034_v21 = vmax.f32 %v1018_v6, 0.0 }
 0x32c   :  { %v1037_v20 = vmax.f32 %v1021_v13, 0.0 }
 0x32d   :  { %v1035_v22 = vmax.f32 %v1019_v17, 0.0 }
 0x32e   :  { %v2842_v23 = vpack.c.bf16 %v1037_v20, %v1036_v19  ;;  %2042 = vmatpush3.bf16.msra.mxu1 %v2834_v51 }
 0x32f   :  { %v2845_v24 = vpack.c.bf16 %v1035_v22, %v1034_v21  ;;  %v2033_v27 = vpop.f32.mrb[28].mxu0 }
 0x330   :  { %v1024_v28 = vadd.f32 %v2033_v27, %v1750_v18  ;;  %v988_v29 = vpop.f32.mrb[29].mxu0 }
 0x331   :  { %v1022_v30 = vadd.f32 %v1750_v18, %v988_v29  ;;  %v2034_v31 = vpop.f32.mrb[30].mxu0  ;;  %2043 = vmatprep.subr.bf16.mxu1 %v2845_v24 }
 0x332   :  { %v1025_v32 = vadd.f32 %v2034_v31, %v1750_v18  ;;  %v991_v36 = vpop.f32.mrb[31].mxu0  ;;  %2044 = vmatpush3.bf16.msra.mxu1 %v2845_v24  ;;  %v1040_v39 = vmax.f32 %v1024_v28, 0.0 }
 0x333   :  { %v1023_v38 = vadd.f32 %v1750_v18, %v991_v36  ;;  %2045 = vmatprep.subr.bf16.mxu1 %v2842_v23  ;;  %v1038_v41 = vmax.f32 %v1022_v30, 0.0  ;;  %v2251_v18 = vld [vmem:[#allocation7 + $0x10] sm:$0xff]  }
 0x334   :  { %v1041_v40 = vmax.f32 %v1025_v32, 0.0 }
 0x335   :  { %v1039_v43 = vmax.f32 %v1023_v38, 0.0 }
 0x336   :  { %v1049_v44 = vpack.c.bf16 %v1041_v40, %v1040_v39  ;;  %2046 = vmatpush3.bf16.msra.mxu1 %v2842_v23 }
 0x337   :  { %v1048_v45 = vpack.c.bf16 %v1039_v43, %v1038_v41 }
 0x339   :  { %2047 = vmatprep.subr.bf16.mxu1 %v1048_v45 }
 0x33a   :  { %2048 = vmatpush3.bf16.msra.mxu1 %v1048_v45 }
 0x33b   :  { %2049 = vmatprep.subr.bf16.mxu1 %v1049_v44 }
 0x33e   :  { %2050 = vmatpush3.bf16.msra.mxu1 %v1049_v44 }
 0x33f   :  { %2067 = vmatprep.subr.bf16.mxu1 %v2249_v47 }
 0x341   :  { %2052 = vmatmul.mubr.bf16.vlgmr.msra.gmra.mrb[16].mxu1 %v457_v61  ;;  %v2255_v61 = vld [vmem:[#allocation7 + $0x30] sm:$0xff]  }
 0x342   :  { %2068 = vmatpush3.bf16.msra.mxu1 %v2249_v47  ;;  %2055 = vmatprep.mubr.bf16.mxu1 %v458_v62  ;;  %v2257_v62 = vld [vmem:[#allocation5] sm:$0xff]  }
 0x343   :  { %2069 = vmatprep.subr.bf16.mxu1 %v2250_v48 }
 0x346   :  { %2070 = vmatpush3.bf16.msra.mxu1 %v2250_v48 }
 0x347   :  { %2071 = vmatprep.subr.bf16.mxu1 %v2251_v18 }
 0x349   :  { %2056 = vmatmul.mubr.bf16.gmra.mrb[20].mxu1 %v459_v0  ;;  %v2259_v0 = vld [vmem:[#allocation5 + $0x10] sm:$0xff]  }
 0x34a   :  { %2072 = vmatpush3.bf16.msra.mxu1 %v2251_v18  ;;  %2059 = vmatprep.mubr.bf16.mxu1 %v460_v1  ;;  %v2260_v1 = vld [vmem:[#allocation5 + $0x18] sm:$0xff]  }
 0x34b   :  { %2073 = vmatprep.subr.bf16.mxu1 %v2252_v49 }
 0x34e   :  { %2074 = vmatpush3.bf16.msra.mxu1 %v2252_v49 }
 0x34f   :  { %2075 = vmatprep.subr.bf16.mxu1 %v2253_v50 }
 0x351   :  { %2060 = vmatmul.mubr.bf16.gmra.mrb[24].mxu1 %v461_v3  ;;  %v2262_v3 = vld [vmem:[#allocation5 + $0x28] sm:$0xff]  }
 0x352   :  { %2076 = vmatpush3.bf16.msra.mxu1 %v2253_v50  ;;  %2063 = vmatprep.mubr.bf16.mxu1 %v462_v4  ;;  %v2263_v4 = vld [vmem:[#allocation5 + $0x30] sm:$0xff]  }
 0x353   :  { %2077 = vmatprep.subr.bf16.mxu1 %v2254_v58 }
 0x356   :  { %2078 = vmatpush3.bf16.msra.mxu1 %v2254_v58 }
 0x357   :  { %2079 = vmatprep.subr.bf16.mxu1 %v2255_v61 }
 0x359   :  { %2064 = vmatmul.mubr.bf16.gmra.mrb[28].mxu1 %v463_v5  ;;  %v2264_v5 = vld [vmem:[#allocation5 + $0x38] sm:$0xff]  }
 0x35a   :  { %2080 = vmatpush3.bf16.msra.mxu1 %v2255_v61  ;;  %2083 = vmatprep.mubr.bf16.mxu1 %v2829_v34 }
 0x35b   :  { %2081 = vmatprep.subr.bf16.mxu1 %v2256_v60 }
 0x35e   :  { %2082 = vmatpush3.bf16.msra.mxu1 %v2256_v60 }
 0x35f   :  { %2099 = vmatprep.subr.bf16.mxu1 %v2257_v62 }
 0x361   :  { %2084 = vmatmul.mubr.bf16.vlgmr.msra.gmra.mrb[32].mxu1 %v2827_v33 }
 0x362   :  { %2087 = vmatprep.mubr.bf16.mxu1 %v2837_v53  ;;  %2100 = vmatpush3.bf16.msra.mxu1 %v2257_v62 }
 0x363   :  { %2101 = vmatprep.subr.bf16.mxu1 %v2258_v63 }
 0x366   :  { %2102 = vmatpush3.bf16.msra.mxu1 %v2258_v63 }
 0x367   :  { %2103 = vmatprep.subr.bf16.mxu1 %v2259_v0 }
 0x369   :  { %2088 = vmatmul.mubr.bf16.gmra.mrb[36].mxu1 %v2834_v51 }
 0x36a   :  { %2091 = vmatprep.mubr.bf16.mxu1 %v2845_v24  ;;  %2104 = vmatpush3.bf16.msra.mxu1 %v2259_v0 }
 0x36b   :  { %2105 = vmatprep.subr.bf16.mxu1 %v2260_v1 }
 0x36e   :  { %2106 = vmatpush3.bf16.msra.mxu1 %v2260_v1 }
 0x36f   :  { %2107 = vmatprep.subr.bf16.mxu1 %v2261_v2 }
 0x371   :  { %2092 = vmatmul.mubr.bf16.gmra.mrb[40].mxu1 %v2842_v23 }
 0x372   :  { %2095 = vmatprep.mubr.bf16.mxu1 %v1048_v45  ;;  %2108 = vmatpush3.bf16.msra.mxu1 %v2261_v2 }
 0x373   :  { %2109 = vmatprep.subr.bf16.mxu1 %v2262_v3 }
 0x376   :  { %2110 = vmatpush3.bf16.msra.mxu1 %v2262_v3 }
 0x377   :  { %2111 = vmatprep.subr.bf16.mxu1 %v2263_v4 }
 0x379   :  { %2096 = vmatmul.mubr.bf16.gmra.mrb[44].mxu1 %v1049_v44 }
 0x37a   :  { %2112 = vmatpush3.bf16.msra.mxu1 %v2263_v4 }
 0x37b   :  { %2113 = vmatprep.subr.bf16.mxu1 %v2264_v5 }
 0x37e   :  { %2114 = vmatpush3.bf16.msra.mxu1 %v2264_v5 }
 0x414   :  { %v2053_v33 = vpop.f32.mrb[16].mxu1 }
 0x415   :  { %v1084_v34 = vpop.f32.mrb[17].mxu1  ;;  %v1149_v53 = vmul.f32 %v2053_v33, %v2780_v10 }
 0x416   :  { %v2054_v51 = vpop.f32.mrb[18].mxu1  ;;  %v1147_v57 = vmul.f32 %v1084_v34, %v2776_v8 }
 0x417   :  { %v1150_v55 = vmul.f32 %v2054_v51, %v2782_v11  ;;  %v1087_v56 = vpop.f32.mrb[19].mxu1 }
 0x418   :  { %v1148_v6 = vmul.f32 %v1087_v56, %v2778_v9 }
 0x419   :  { %v1164_v7 = vpack.c.bf16 %v1150_v55, %v1149_v53 }
 0x41a   :  { %v1163_v13 = vpack.c.bf16 %v1148_v6, %v1147_v57 }
 0x41c   :  { %v2057_v15 = vpop.f32.mrb[20].mxu1  ;;  %2115 = vmatprep.mubr.bf16.mxu1 %v1163_v13 }
 0x41d   :  { %v1100_v17 = vpop.f32.mrb[21].mxu1  ;;  %2116 = vmatmul.mubr.bf16.vlgmr.msra.gmra.mrb[32].mxu1 %v1164_v7  ;;  %v1153_v20 = vmul.f32 %v2057_v15, %v2788_v14 }
 0x41e   :  { %v2058_v19 = vpop.f32.mrb[22].mxu1  ;;  %v1151_v10 = vmul.f32 %v1100_v17, %v2784_v59 }
 0x41f   :  { %v1154_v21 = vmul.f32 %v2058_v19, %v2790_v16  ;;  %v1103_v22 = vpop.f32.mrb[23].mxu1 }
 0x420   :  { %v1152_v11 = vmul.f32 %v1103_v22, %v2786_v12 }
 0x421   :  { %v1166_v23 = vpack.c.bf16 %v1154_v21, %v1153_v20 }
 0x422   :  { %v1165_v8 = vpack.c.bf16 %v1152_v11, %v1151_v10 }
 0x424   :  { %v2061_v24 = vpop.f32.mrb[24].mxu1  ;;  %2119 = vmatprep.mubr.bf16.mxu1 %v1165_v8 }
 0x425   :  { %v1116_v9 = vpop.f32.mrb[25].mxu1  ;;  %2120 = vmatmul.mubr.bf16.gmra.mrb[36].mxu1 %v1166_v23  ;;  %v1157_v28 = vmul.f32 %v2061_v24, %v2804_v35 }
 0x426   :  { %v2062_v27 = vpop.f32.mrb[26].mxu1  ;;  %v1155_v14 = vmul.f32 %v1116_v9, %v2796_v25 }
 0x427   :  { %v1158_v29 = vmul.f32 %v2062_v27, %v2806_v37  ;;  %v1119_v30 = vpop.f32.mrb[27].mxu1 }
 0x428   :  { %v1156_v16 = vmul.f32 %v1119_v30, %v2798_v26  ;;  %v2400_v26 = vmov 0.0  }
 0x429   :  { %v1168_v31 = vpack.c.bf16 %v1158_v29, %v1157_v28  ;;  %2131 = vmatprep.subr.bf16.mxu0 %v2400_v26  ;;  %2147 = vmatprep.mubr.msk.bf16.mxu0 %vm2401_vm0, %v2400_v26 }
 0x42a   :  { %v1167_v59 = vpack.c.bf16 %v1156_v16, %v1155_v14 }
 0x42c   :  { %v2065_v32 = vpop.f32.mrb[28].mxu1  ;;  %2123 = vmatprep.mubr.bf16.mxu1 %v1167_v59 }
 0x42d   :  { %v1132_v12 = vpop.f32.mrb[29].mxu1  ;;  %2124 = vmatmul.mubr.bf16.gmra.mrb[40].mxu1 %v1168_v31  ;;  %v1161_v38 = vmul.f32 %v2065_v32, %v2816_v52  ;;  %v1767_v52 = vld [vmem:[%s2938_s10] ss:$0 sm:$0xff] }
 0x42e   :  { %v2066_v36 = vpop.f32.mrb[30].mxu1  ;;  %v1159_v35 = vmul.f32 %v1132_v12, %v2808_v42 }
 0x42f   :  { %v1162_v39 = vmul.f32 %v2066_v36, %v2818_v54  ;;  %v1135_v40 = vpop.f32.mrb[31].mxu1 }
 0x430   :  { %v1160_v37 = vmul.f32 %v1135_v40, %v2812_v46  ;;  %v2265_v40 = vld [vmem:[#allocation8] sm:$0xff]  }
 0x431   :  { %v1170_v41 = vpack.c.bf16 %v1162_v39, %v1161_v38  ;;  %v1540_v39 = vld [vmem:[%s2939_s11] sm:$0xf] }
 0x432   :  { %v1169_v25 = vpack.c.bf16 %v1160_v37, %v1159_v35  ;;  %v2266_v35 = vld [vmem:[#allocation8 + $0x8] sm:$0xff]   ;;  %v2267_v37 = vld [vmem:[#allocation8 + $0x10] sm:$0xff]  }
 0x434   :  { %2127 = vmatprep.mubr.bf16.mxu1 %v1169_v25  ;;  %v2269_v25 = vld [vmem:[#allocation8 + $0x20] sm:$0xff]  }
 0x435   :  { %2128 = vmatmul.mubr.bf16.gmra.mrb[44].mxu1 %v1170_v41  ;;  %v2268_v41 = vld [vmem:[#allocation8 + $0x18] sm:$0xff]  }
 0x4f0   :  { %v2117_v54 = vpop.f32.mrb[32].mxu1 }
 0x4f1   :  { %v1502_v43 = vadd.f32 %v2117_v54, %v1767_v52  ;;  %v1430_v42 = vpop.f32.mrb[33].mxu1  ;;  %v2271_v54 = vld [vmem:[#allocation8 + $0x30] sm:$0xff]  }
 0x4f2   :  { %v1500_v44 = vadd.f32 %v1767_v52, %v1430_v42  ;;  %v2118_v46 = vpop.f32.mrb[34].mxu1  ;;  %v1585_v42 = vpop.permute.xlu0 %1584 }
 0x4f3   :  { %v1503_v45 = vadd.f32 %v2118_v46, %v1767_v52  ;;  %v1433_v47 = vpop.f32.mrb[35].mxu1  ;;  %v1518_v18 = vmax.f32 %v1502_v43, 0.0  ;;  %v2272_v43 = vld [vmem:[#allocation8 + $0x38] sm:$0xff]  }
 0x4f4   :  { %v1501_v48 = vadd.f32 %v1767_v52, %v1433_v47  ;;  %v1516_v50 = vmax.f32 %v1500_v44, 0.0 }
 0x4f5   :  { %v1519_v49 = vmax.f32 %v1503_v45, 0.0 }
 0x4f6   :  { %v1517_v58 = vmax.f32 %v1501_v48, 0.0 }
 0x4f7   :  { %v1533_v61 = vpack.c.bf16 %v1519_v49, %v1518_v18  ;;  %v1768_v49 = vld [vmem:[%s2942_s14] ss:$0 sm:$0xff] }
 0x4f8   :  { %v1532_v60 = vpack.c.bf16 %v1517_v58, %v1516_v50  ;;  %v2121_v62 = vpop.f32.mrb[36].mxu1 }
 0x4f9   :  { %v1506_v63 = vadd.f32 %v2121_v62, %v1767_v52  ;;  %v1446_v0 = vpop.f32.mrb[37].mxu1 }
 0x4fa   :  { %v1504_v1 = vadd.f32 %v1767_v52, %v1446_v0  ;;  %v2122_v2 = vpop.f32.mrb[38].mxu1  ;;  %2132 = vmatpush3.bf16.msra.mxu0 %v1532_v60 }
 0x4fb   :  { %v1507_v3 = vadd.f32 %v2122_v2, %v1767_v52  ;;  %v1449_v4 = vpop.f32.mrb[39].mxu1  ;;  %2133 = vmatprep.subr.bf16.mxu0 %v2400_v26  ;;  %v1522_v33 = vmax.f32 %v1506_v63, 0.0 }
 0x4fc   :  { %v1505_v5 = vadd.f32 %v1767_v52, %v1449_v4  ;;  %v1520_v51 = vmax.f32 %v1504_v1, 0.0 }
 0x4fd   :  { %v1523_v34 = vmax.f32 %v1507_v3, 0.0 }
 0x4fe   :  { %v1521_v53 = vmax.f32 %v1505_v5, 0.0  ;;  %2134 = vmatpush3.bf16.msra.mxu0 %v1533_v61 }
 0x4ff   :  { %v1535_v55 = vpack.c.bf16 %v1523_v34, %v1522_v33  ;;  %2135 = vmatprep.subr.bf16.mxu0 %v2400_v26 }
 0x500   :  { %v1534_v56 = vpack.c.bf16 %v1521_v53, %v1520_v51  ;;  %v2125_v57 = vpop.f32.mrb[40].mxu1 }
 0x501   :  { %v1510_v6 = vadd.f32 %v2125_v57, %v1767_v52  ;;  %v1462_v7 = vpop.f32.mrb[41].mxu1 }
 0x502   :  { %v1508_v13 = vadd.f32 %v1767_v52, %v1462_v7  ;;  %v2126_v15 = vpop.f32.mrb[42].mxu1  ;;  %2136 = vmatpush3.bf16.msra.mxu0 %v1534_v56 }
 0x503   :  { %v1511_v17 = vadd.f32 %v2126_v15, %v1767_v52  ;;  %v1465_v19 = vpop.f32.mrb[43].mxu1  ;;  %2137 = vmatprep.subr.bf16.mxu0 %v2400_v26  ;;  %v1526_v21 = vmax.f32 %v1510_v6, 0.0 }
 0x504   :  { %v1509_v20 = vadd.f32 %v1767_v52, %v1465_v19  ;;  %v1524_v10 = vmax.f32 %v1508_v13, 0.0 }
 0x505   :  { %v1527_v22 = vmax.f32 %v1511_v17, 0.0 }
 0x506   :  { %v1525_v11 = vmax.f32 %v1509_v20, 0.0  ;;  %2138 = vmatpush3.bf16.msra.mxu0 %v1535_v55 }
 0x507   :  { %v1537_v23 = vpack.c.bf16 %v1527_v22, %v1526_v21  ;;  %2139 = vmatprep.subr.bf16.mxu0 %v2400_v26 }
 0x508   :  { %v1536_v8 = vpack.c.bf16 %v1525_v11, %v1524_v10  ;;  %v2129_v24 = vpop.f32.mrb[44].mxu1 }
 0x509   :  { %v1514_v9 = vadd.f32 %v2129_v24, %v1767_v52  ;;  %v1478_v27 = vpop.f32.mrb[45].mxu1 }
 0x50a   :  { %v1512_v28 = vadd.f32 %v1767_v52, %v1478_v27  ;;  %v2130_v29 = vpop.f32.mrb[46].mxu1  ;;  %2140 = vmatpush3.bf16.msra.mxu0 %v1536_v8 }
 0x50b   :  { %v1515_v30 = vadd.f32 %v2130_v29, %v1767_v52  ;;  %v1481_v14 = vpop.f32.mrb[47].mxu1  ;;  %2141 = vmatprep.subr.bf16.mxu0 %v2400_v26  ;;  %v1530_v31 = vmax.f32 %v1514_v9, 0.0 }
 0x50c   :  { %v1513_v16 = vadd.f32 %v1767_v52, %v1481_v14  ;;  %v1528_v32 = vmax.f32 %v1512_v28, 0.0  ;;  %v2270_v52 = vld [vmem:[#allocation8 + $0x28] sm:$0xff]  }
 0x50d   :  { %v1531_v59 = vmax.f32 %v1515_v30, 0.0 }
 0x50e   :  { %v1529_v12 = vmax.f32 %v1513_v16, 0.0  ;;  %2142 = vmatpush3.bf16.msra.mxu0 %v1537_v23 }
 0x50f   :  { %v1539_v36 = vpack.c.bf16 %v1531_v59, %v1530_v31  ;;  %2143 = vmatprep.subr.bf16.mxu0 %v2400_v26 }
 0x510   :  { %v1538_v38 = vpack.c.bf16 %v1529_v12, %v1528_v32 }
 0x512   :  { %2144 = vmatpush3.bf16.msra.mxu0 %v1538_v38 }
 0x513   :  { %2145 = vmatprep.subr.bf16.mxu0 %v2400_v26 }
 0x516   :  { %2146 = vmatpush3.bf16.msra.mxu0 %v1539_v36 }
 0x517   :  { %2151 = vmatprep.subr.bf16.mxu0 %v2400_v26 }
 0x519   :  { %2148 = vmatmul.mubr.bf16.vlgmr.msra.gmra.mrb[32].mxu0 %v1540_v39 }
 0x51a   :  { %2152 = vmatpush3.bf16.msra.mxu0 %v2265_v40  ;;  %2167 = vmatprep.mubr.msk.bf16.mxu0 %vm2401_vm0, %v2400_v26 }
 0x51b   :  { %2153 = vmatprep.subr.bf16.mxu0 %v2400_v26 }
 0x51e   :  { %2154 = vmatpush3.bf16.msra.mxu0 %v2266_v35 }
 0x51f   :  { %2155 = vmatprep.subr.bf16.mxu0 %v2400_v26 }
 0x522   :  { %2156 = vmatpush3.bf16.msra.mxu0 %v2267_v37 }
 0x523   :  { %2157 = vmatprep.subr.bf16.mxu0 %v2400_v26 }
 0x526   :  { %2158 = vmatpush3.bf16.msra.mxu0 %v2268_v41 }
 0x527   :  { %2159 = vmatprep.subr.bf16.mxu0 %v2400_v26 }
 0x52a   :  { %2160 = vmatpush3.bf16.msra.mxu0 %v2269_v25 }
 0x52b   :  { %2161 = vmatprep.subr.bf16.mxu0 %v2400_v26 }
 0x52e   :  { %2162 = vmatpush3.bf16.msra.mxu0 %v2270_v52 }
 0x52f   :  { %2163 = vmatprep.subr.bf16.mxu0 %v2400_v26 }
 0x532   :  { %2164 = vmatpush3.bf16.msra.mxu0 %v2271_v54 }
 0x533   :  { %2165 = vmatprep.subr.bf16.mxu0 %v2400_v26 }
 0x536   :  { %2166 = vmatpush3.bf16.msra.mxu0 %v2272_v43 }
 0x5ec   :  { %v1575_v44 = vpop.f32.mrb[32].mxu0 }
 0x5ed   :  { %v1587_v46 = vmul.f32 %v1585_v42, %v1575_v44  ;;  %v2149_v45 = vpop.f32.mrb[33].mxu0 }
 0x5ee   :  { %v1578_v47 = vpop.f32.mrb[34].mxu0 }
 0x5ef   :  { %v1588_v48 = vpack.c.bf16 %v1587_v46, %v1587_v46  ;;  %v2150_v18 = vpop.f32.mrb[35].mxu0 }
 0x5f1   :  { %2168 = vmatmul.mubr.bf16.vlgmr.msra.gmra.mrb[36].mxu0 %v1588_v48 }
 0x6c4   :  { %v1694_v50 = vpop.f32.mrb[36].mxu0 }
 0x6c5   :  { %v1695_v58 = vadd.f32 %v1768_v49, %v1694_v50  ;;  %v2169_v61 = vpop.f32.mrb[37].mxu0 }
 0x6c6   :  { %v1697_v26 = vpop.f32.mrb[38].mxu0 }
 0x6c7   :  { %1700 = vst [vmem:[#allocation10] sm:$0xff] %v1695_v58  ;;  %v2170_v60 = vpop.f32.mrb[39].mxu0 }
 0x6c8   :  { %2372 = shalt.err (!%p2369_p8)
}
 0x6c9   :  { %s2373_s14 = scalar_lea.hbm %s2943_s15, 128 }
 0x6ca   :  { %p2374_p9 = scmp.ne.s32.totalorder %s2943_s15, %s2373_s14  ;;  %p2377_p10 = scmp.lt.u32.totalorder %s2373_s14, %s2943_s15 }
 0x6cc   :  { %p2379_p11 = pnand %p2377_p10, %p2374_p9 }
 0x6ce   :  { %2382 = shalt.err (!%p2379_p11)
}
 0x6cf   :  { %1710 = dma.vmem_to_hbm [thread:$0]  %s1708_s1, 128, %s2943_s15, [#allocation4]  }
 0x6d0   :  { %2389 = dma.done.wait [#allocation4], 128  }
 0x6d1   :  { %2390 = vsyncadd [#allocation4], 4294967168 }
 0x6d2   :  { %1714 = vsyncpa [#allocation3], 1 }
 0x6d3   :  { %1715 = vsyncpa [#allocation6], 1 }
 0x6d4   :  { %1716 = vsyncpa [#allocation9], 1 }
 0x6d5   :  { %1717 = vsyncpa [#allocation4], 1 }

</bundles_post_ra>
